<compile_context>
chip_gen: v5e
topology: v5e:2x2
jax: 0.10.0
libtpu: 0.0.40
codegen_flags: <defaults>
</compile_context>

<pallas_src>
import jax
import jax.numpy as jnp
from jax.experimental import pallas as pl
from jax.experimental.pallas import tpu as pltpu

N, D = 500, 28  # module-defined sizes


def net2_kernel(keys_t_ref, values_ref, q_ref, out_ref, amax_ref):
    kt = keys_t_ref[...]                                          # (D, N)  f32
    v = values_ref[...]                                           # (N, 1)  f32
    q = q_ref[...]                                                # (TB, D) f32

    # logits on the MXU: (TB, D) @ (D, N) -> (TB, N), N on the lane axis
    logits = jnp.dot(q, kt, preferred_element_type=jnp.float32,
                     precision=jax.lax.Precision.HIGHEST)         # (TB, N)

    # numerically stable softmax over the lane axis (dim 0 of the torch module)
    m = jnp.max(logits, axis=-1, keepdims=True)                   # (TB, 1)
    p = jnp.exp(logits - m)                                       # (TB, N)
    denom = jnp.sum(p, axis=-1, keepdims=True)                    # (TB, 1)

    # fold normalization into the output: contract over N on the MXU (K=500),
    # then one exact divide per query (tiny (TB,1) tensor).
    s = jnp.dot(p, v, preferred_element_type=jnp.float32,
                precision=jax.lax.Precision.HIGHEST)              # (TB, 1)
    out_ref[...] = s / denom

    # argmax over N (min index among maxima) for the host-side meta Counter.
    col = jax.lax.broadcasted_iota(jnp.int32, logits.shape, 1)    # (TB, N)
    amax_ref[...] = jnp.min(jnp.where(logits == m, col, logits.shape[-1]),
                            axis=-1, keepdims=True)


def _net2_call(keys_t, values, queries, *, tb=1024):
    """keys_t: (D, N), values: (N, 1), queries: (B, D) -> ((B, 1) f32, (B, 1) i32).

    tb caps the per-grid-step query block (multiple of 8 when < B); keeps per-step
    VMEM small for v7x's 64 MiB VMEM while letting B scale into the thousands.
    """
    d, n = keys_t.shape
    B = queries.shape[0]
    tb = B if B <= tb else tb                     # tb is a multiple of 8 when tb < B
    grid = (pl.cdiv(B, tb),)

    return pl.pallas_call(
        net2_kernel,
        grid=grid,
        out_shape=(jax.ShapeDtypeStruct((B, 1), jnp.float32),
                   jax.ShapeDtypeStruct((B, 1), jnp.int32)),
        in_specs=[
            pl.BlockSpec((d, n), lambda i: (0, 0)),      # keys^T, resident
            pl.BlockSpec((n, 1), lambda i: (0, 0)),      # values, resident
            pl.BlockSpec((tb, d), lambda i: (i, 0)),     # query block
        ],
        out_specs=(pl.BlockSpec((tb, 1), lambda i: (i, 0)),
                   pl.BlockSpec((tb, 1), lambda i: (i, 0))),
        compiler_params=pltpu.CompilerParams(
            dimension_semantics=("parallel",)),          # v7x: split batch across TCs
    )(keys_t, values, queries)


def net2_forward(keys_t, values, query):
    """Single-query forward (module semantics): query (28,) -> out (1,), amax ()."""
    out, amax = _net2_call(keys_t, values, query.reshape(1, D))
    return out.reshape((1,)), amax.reshape(())


def net2_forward_batched(keys_t, values, queries):
    """Batched forward: queries (B, 28) -> out (B, 1), amax (B, 1)."""
    return _net2_call(keys_t, values, queries)


if __name__ == "__main__":
    from collections import Counter

    key = jax.random.PRNGKey(0)
    k_keys, k_vals, k_q = jax.random.split(key, 3)

    # deterministic "parameters" (stand-in for torch.randn init; f64 -> f32 on TPU)
    keys_param = jax.random.normal(k_keys, (N, D), dtype=jnp.float32)
    values_param = jax.random.normal(k_vals, (N, 1), dtype=jnp.float32)
    query = jax.random.normal(k_q, (D,), dtype=jnp.float32)

    # one-time parameter prep: transpose/cast at init, not per forward
    keys_t = jnp.asarray(keys_param.T, dtype=jnp.float32)       # (D, N)
    values_f32 = jnp.asarray(values_param, dtype=jnp.float32)   # (N, 1)

    # single-query forward (matches nn.Module.forward)
    out, amax = net2_forward(keys_t, values_f32, query)
    jax.block_until_ready(out)

    # host-side `meta` Counter update (replaces the in-module Python side effect)
    meta = Counter()
    meta.update([str(int(amax))])

    # pure-JAX reference
    logits_ref = jnp.dot(keys_param, query, precision=jax.lax.Precision.HIGHEST)
    attn_ref = jax.nn.softmax(logits_ref, axis=0)
    out_ref = jnp.dot(attn_ref, values_param,
                      precision=jax.lax.Precision.HIGHEST).reshape((1,))
    assert jnp.allclose(out, out_ref, rtol=1e-3, atol=1e-5), (out, out_ref)
    assert attn_ref[int(amax)] >= attn_ref.max() - 1e-5, (int(amax), attn_ref.max())

    # batched path sanity check (B=8)
    queries = jax.random.normal(jax.random.PRNGKey(1), (8, D), dtype=jnp.float32)
    out_b, amax_b = net2_forward_batched(keys_t, values_f32, queries)
    jax.block_until_ready(out_b)
    logits_b = jnp.dot(keys_param, queries.T,
                       precision=jax.lax.Precision.HIGHEST)     # (N, B)
    attn_b = jax.nn.softmax(logits_b, axis=0)                   # (N, B)
    out_b_ref = (attn_b * values_param).sum(axis=0)[:, None]    # (B, 1)
    assert jnp.allclose(out_b, out_b_ref, rtol=1e-3, atol=1e-5), (out_b, out_b_ref)
    for b in range(queries.shape[0]):
        assert attn_b[int(amax_b[b, 0]), b] >= attn_b[:, b].max() - 1e-5

    print("KERNEL_OK")
</pallas_src>

<mosaic_0001>
module attributes {stable_mosaic.version = 11 : i64} {
  func.func @net2_kernel(%arg0: i32, %arg1: memref<28x500xf32, #tpu.memory_space<vmem>>, %arg2: memref<500x1xf32, #tpu.memory_space<vmem>>, %arg3: memref<1x28xf32, #tpu.memory_space<vmem>>, %arg4: memref<1x1xf32, #tpu.memory_space<vmem>>, %arg5: memref<1x1xi32, #tpu.memory_space<vmem>>) attributes {dimension_semantics = [#tpu.dimension_semantics<parallel>], iteration_bounds = array<i64: 1>, scalar_prefetch = 0 : i64, scratch_operands = 0 : i64, tpu.core_type = #tpu.core_type<tc>, window_params = [{pipeline_mode = #tpu.pipeline_mode<synchronous>, transform_indices = @transform_0, window_bounds = array<i64: 28, 500>}, {pipeline_mode = #tpu.pipeline_mode<synchronous>, transform_indices = @transform_1, window_bounds = array<i64: 500, 1>}, {transform_indices = @transform_2, window_bounds = array<i64: 1, 28>}, {transform_indices = @transform_3, window_bounds = array<i64: 1, 1>}, {transform_indices = @transform_4, window_bounds = array<i64: 1, 1>}]} {
    %c0 = arith.constant 0 : index
    %c0_0 = arith.constant 0 : index
    %0 = vector.load %arg1[%c0, %c0_0] : memref<28x500xf32, #tpu.memory_space<vmem>>, vector<28x500xf32>
    %c0_1 = arith.constant 0 : index
    %c0_2 = arith.constant 0 : index
    %1 = vector.load %arg2[%c0_1, %c0_2] : memref<500x1xf32, #tpu.memory_space<vmem>>, vector<500x1xf32>
    %c0_3 = arith.constant 0 : index
    %c0_4 = arith.constant 0 : index
    %2 = vector.load %arg3[%c0_3, %c0_4] : memref<1x28xf32, #tpu.memory_space<vmem>>, vector<1x28xf32>
    %cst = arith.constant dense<0.000000e+00> : vector<1x500xf32>
    %3 = tpu.matmul %2, %0, %cst {dimension_numbers = #tpu.dot_dimension_numbers<[1], [0], [0], [1], [0, 0, 1, 1], [], []>, precision = #tpu.contract_precision<fp32>} : vector<1x28xf32>, vector<28x500xf32>, vector<1x500xf32> -> vector<1x500xf32>
    %cst_5 = arith.constant dense<0xFF800000> : vector<1xf32>
    %4 = vector.multi_reduction <maximumf>, %3, %cst_5 [1] : vector<1x500xf32> to vector<1xf32>
    %5 = vector.shape_cast %4 : vector<1xf32> to vector<1x1xf32>
    %6 = vector.broadcast %5 : vector<1x1xf32> to vector<1x500xf32>
    %7 = arith.subf %3, %6 : vector<1x500xf32>
    %8 = math.exp %7 : vector<1x500xf32>
    %cst_6 = arith.constant dense<0.000000e+00> : vector<1xf32>
    %9 = vector.multi_reduction <add>, %8, %cst_6 [1] : vector<1x500xf32> to vector<1xf32>
    %10 = vector.shape_cast %9 : vector<1xf32> to vector<1x1xf32>
    %cst_7 = arith.constant dense<0.000000e+00> : vector<1x1xf32>
    %11 = tpu.matmul %8, %1, %cst_7 {dimension_numbers = #tpu.dot_dimension_numbers<[1], [0], [0], [1], [0, 0, 1, 1], [], []>, precision = #tpu.contract_precision<fp32>} : vector<1x500xf32>, vector<500x1xf32>, vector<1x1xf32> -> vector<1x1xf32>
    %12 = arith.divf %11, %10 : vector<1x1xf32>
    %c0_8 = arith.constant 0 : index
    %c0_9 = arith.constant 0 : index
    %13 = vector.load %arg4[%c0_8, %c0_9] : memref<1x1xf32, #tpu.memory_space<vmem>>, vector<1x1xf32>
    tpu.vector_store %arg4[%c0_8, %c0_9], %12 {strides = array<i32>} : memref<1x1xf32, #tpu.memory_space<vmem>>, vector<1x1xf32>,
    %14 = tpu.iota {dimensions = array<i32: 1>} : vector<1x500xi32>
    %15 = vector.broadcast %5 : vector<1x1xf32> to vector<1x500xf32>
    %16 = arith.cmpf oeq, %3, %15 : vector<1x500xf32>
    %c500_i32 = arith.constant 500 : i32
    %17 = vector.broadcast %c500_i32 : i32 to vector<1x500xi32>
    %18 = arith.select %16, %14, %17 : vector<1x500xi1>, vector<1x500xi32>
    %cst_10 = arith.constant dense<2147483647> : vector<1xi32>
    %19 = vector.multi_reduction <minsi>, %18, %cst_10 [1] : vector<1x500xi32> to vector<1xi32>
    %20 = vector.shape_cast %19 : vector<1xi32> to vector<1x1xi32>
    %c0_11 = arith.constant 0 : index
    %c0_12 = arith.constant 0 : index
    %21 = vector.load %arg5[%c0_11, %c0_12] : memref<1x1xi32, #tpu.memory_space<vmem>>, vector<1x1xi32>
    tpu.vector_store %arg5[%c0_11, %c0_12], %20 {strides = array<i32>} : memref<1x1xi32, #tpu.memory_space<vmem>>, vector<1x1xi32>,
    return
  }
  func.func @transform_0(%arg0: i32) -> (i32, i32) {
    %c0_i32 = arith.constant 0 : i32
    %c0_i32_0 = arith.constant 0 : i32
    %c0_i32_1 = arith.constant 0 : i32
    return %c0_i32, %c0_i32_0 : i32, i32
  }
  func.func @transform_1(%arg0: i32) -> (i32, i32) {
    %c0_i32 = arith.constant 0 : i32
    %c0_i32_0 = arith.constant 0 : i32
    %c0_i32_1 = arith.constant 0 : i32
    return %c0_i32, %c0_i32_0 : i32, i32
  }
  func.func @transform_2(%arg0: i32) -> (i32, i32) {
    %c0_i32 = arith.constant 0 : i32
    %c0_i32_0 = arith.constant 0 : i32
    return %arg0, %c0_i32 : i32, i32
  }
  func.func @transform_3(%arg0: i32) -> (i32, i32) {
    %c0_i32 = arith.constant 0 : i32
    %c0_i32_0 = arith.constant 0 : i32
    return %arg0, %c0_i32 : i32, i32
  }
  func.func @transform_4(%arg0: i32) -> (i32, i32) {
    %c0_i32 = arith.constant 0 : i32
    %c0_i32_0 = arith.constant 0 : i32
    return %arg0, %c0_i32 : i32, i32
  }
}

</mosaic_0001>

<bundles_post_ra>
// kernel: tpu_custom_call.1
= control target key start
LH: loop header
LB: loop body
LE: loop exit
PB: predicated region body
PF: predicated region fallthrough
CT: control target
= control target key end

     0   :  { %10 = vsyncpa [#allocation3], 0  ;;  %vm102_vm0 = vcmask 1043456   ;;  %vm98_vm1 = vcmask 228352   ;;  %s3959_s0 = inlined_call_operand.vmem [shape: f32[28,500], index: 0, kind: input, shape index: {}]   ;;  %s3960_s1 = inlined_call_operand.vmem [shape: f32[500,1], index: 1, kind: input, shape index: {}]   ;;  %s3961_s2 = inlined_call_operand.vmem [shape: f32[1,28], index: 2, kind: input, shape index: {}]   ;;  %s3962_s3 = inlined_call_operand.hbm [shape: f32[1,1], index: 3, kind: output, shape index: {0}]   ;;  %s3963_s4 = inlined_call_operand.hbm [shape: s32[1,1], index: 4, kind: output, shape index: {1}]  }
   0x1   :  { %v30_v0 = vld [vmem:[%s3959_s0 + $0x60] sm:$0xf]  ;;  %v31_v11 = vld [vmem:[%s3959_s0 + $0x68] sm:$0xf] }
   0x2   :  { %v26_v1 = vld [vmem:[%s3959_s0 + $0x40] sm:$0xff]  ;;  %v104_v3 = vsel %vm102_vm0, %v30_v0, 0  ;;  %v27_v12 = vld [vmem:[%s3959_s0 + $0x48] sm:$0xff]  ;;  %v107_v16 = vsel %vm102_vm0, %v31_v11, 0 }
   0x3   :  { %v22_v2 = vld [vmem:[%s3959_s0 + $0x20] sm:$0xff]  ;;  %v2433_v4 = vand.u32 4294901760, %v26_v1  ;;  %v2443_v8 = vand.u32 4294901760, %v104_v3  ;;  %v23_v17 = vld [vmem:[%s3959_s0 + $0x28] sm:$0xff]  ;;  %v2471_v20 = vand.u32 4294901760, %v107_v16  ;;  %v2473_v21 = vand.u32 4294901760, %v27_v12 }
   0x4   :  { %v2435_v5 = vand.u32 4294901760, %v22_v2  ;;  %v18_v6 = vld [vmem:[%s3959_s0] sm:$0xff]  ;;  %v2480_v25 = vand.u32 4294901760, %v23_v17 }
   0x5   :  { %v97_v7 = vld [vmem:[%s3961_s2] sm:$0x1]  ;;  %v2445_v9 = vand.u32 4294901760, %v18_v6  ;;  %v2454_v13 = vsub.f32 %v26_v1, %v2433_v4  ;;  %128 = vmatpush.msra.mxu0 %v2443_v8  ;;  %v157_v18 = vsub.f32 %v104_v3, %v2443_v8  ;;  %228 = vmatpush.msra.mxu3 %v2443_v8  ;;  %v2484_v27 = vsub.f32 %v107_v16, %v2471_v20 }
   0x6   :  { %v100_v10 = vsel %vm98_vm1, %v97_v7, 0  ;;  %v2457_v14 = vsub.f32 %v22_v2, %v2435_v5  ;;  %v2488_v29 = vsub.f32 %v27_v12, %v2473_v21 }
   0x7   :  { %v2459_v15 = vand.u32 4294901760, %v100_v10  ;;  %v2469_v19 = vsub.f32 %v18_v6, %v2445_v9  ;;  %v164_v22 = vand.u32 4294901760, %v2454_v13  ;;  %199 = vmatpush.msra.mxu2 %v157_v18  ;;  %130 = vmatpush.msra.mxu0 %v2433_v4  ;;  %v158_v26 = vand.u32 4294901760, %v157_v18 }
   0x8   :  { %v170_v24 = vand.u32 4294901760, %v2457_v14 }
   0x9   :  { %v2477_v23 = vsub.f32 %v100_v10, %v2459_v15  ;;  %v176_v28 = vand.u32 4294901760, %v2469_v19 }
   0xa   :  { %11 = vsyncpa [#allocation5], 0  ;;  %230 = vmatpush.msra.mxu3 %v2433_v4  ;;  %v165_v30 = vsub.f32 %v2454_v13, %v164_v22  ;;  %v2496_v32 = vsub.f32 %v23_v17, %v2480_v25  ;;  %202 = vmatpush.msra.mxu2 %v2454_v13  ;;  %v159_v33 = vsub.f32 %v157_v18, %v158_v26  ;;  %v343_v35 = vand.u32 4294901760, %v2484_v27  ;;  %v19_v37 = vld [vmem:[%s3959_s0 + $0x8] sm:$0xff]  ;;  %v32_v52 = vld [vmem:[%s3959_s0 + $0x70] sm:$0xf] }
   0xb   :  { %v2493_v31 = vand.u32 4294901760, %v2477_v23  ;;  %132 = vmatpush.msra.mxu0 %v2435_v5  ;;  %v171_v34 = vsub.f32 %v2457_v14, %v170_v24  ;;  %v349_v36 = vand.u32 4294901760, %v2488_v29  ;;  %v177_v39 = vsub.f32 %v2469_v19, %v176_v28  ;;  %v28_v58 = vld [vmem:[%s3959_s0 + $0x50] sm:$0xff]  ;;  %v33_v61 = vld [vmem:[%s3959_s0 + $0x78] sm:$0xf]  ;;  %s2318_s11 = sshll.u32 %s3963_s4, 4  ;;  %s2319_s11 = int_to_ptr.hbm [resolvable:$true] %s2318_s11 }
   0xc   :  { %232 = vmatpush.msra.mxu3 %v2435_v5  ;;  %v355_v40 = vand.u32 4294901760, %v2496_v32  ;;  %v160_v41 = vand.u32 4294901760, %v159_v33  ;;  %205 = vmatpush.msra.mxu2 %v2457_v14  ;;  %v166_v42 = vand.u32 4294901760, %v165_v30  ;;  %v344_v43 = vsub.f32 %v2484_v27, %v343_v35  ;;  %v24_v63 = vld [vmem:[%s3959_s0 + $0x30] sm:$0xff]  ;;  %v29_v6 = vld [vmem:[%s3959_s0 + $0x58] sm:$0xff]  ;;  %s2397_s4 = smov [#allocation2]  }
   0xd   :  { %v138_v38 = vsub.f32 %v2477_v23, %v2493_v31  ;;  %134 = vmatpush.msra.mxu0 %v2445_v9  ;;  %v350_v44 = vsub.f32 %v2488_v29, %v349_v36  ;;  %v2522_v46 = vand.u32 4294901760, %v19_v37  ;;  %v172_v47 = vand.u32 4294901760, %v171_v34  ;;  %v20_v1 = vld [vmem:[%s3959_s0 + $0x10] sm:$0xff]  ;;  %v25_v10 = vld [vmem:[%s3959_s0 + $0x38] sm:$0xff]  ;;  %s2305_s12 = sshll.u32 %s2397_s4, 4  ;;  %s2307_s15 = sshll.u32 %s3962_s3, 4  ;;  %s2306_s12 = int_to_ptr.vmem [resolvable:$true] %s2305_s12  ;;  %s2308_s15 = int_to_ptr.hbm [resolvable:$true] %s2307_s15 }
   0xe   :  { %234 = vmatpush.msra.mxu3 %v2445_v9  ;;  %161 = vmatpush.msra.mxu1 %v160_v41  ;;  %v345_v48 = vand.u32 4294901760, %v344_v43  ;;  %v356_v49 = vsub.f32 %v2496_v32, %v355_v40  ;;  %v178_v53 = vand.u32 4294901760, %v177_v39  ;;  %v110_v56 = vsel %vm102_vm0, %v32_v52, 0  ;;  %v21_v13 = vld [vmem:[%s3959_s0 + $0x18] sm:$0xff] }
   0xf   :  { %v2520_v45 = vand.u32 4294901760, %v138_v38  ;;  %257 = vmatpush.msrb.mxu0 %v158_v26  ;;  %208 = vmatpush.msra.mxu2 %v2469_v19  ;;  %v351_v50 = vand.u32 4294901760, %v350_v44  ;;  %v2531_v51 = vsub.f32 %v19_v37, %v2522_v46  ;;  %v2547_v60 = vand.u32 4294901760, %v110_v56 }
  0x10   :  { %211 = vmatmul.f32.vlgmr.msra.gmra.mxu2 %v2477_v23  ;;  %167 = vmatpush.msra.mxu1 %v166_v42  ;;  %v357_v55 = vand.u32 4294901760, %v356_v49  ;;  %v2554_v62 = vand.u32 4294901760, %v28_v58  ;;  %v113_v2 = vsel %vm102_vm0, %v33_v61, 0  ;;  %v2571_v3 = vand.u32 4294901760, %v24_v63 }
  0x11   :  { %140 = vmatmul.f32.vlgmr.msra.gmra.mxu0 %v2520_v45  ;;  %238 = vmatmul.f32.vlgmr.msra.gmra.mxu3 %v2493_v31  ;;  %v361_v54 = vand.u32 4294901760, %v2531_v51  ;;  %v2563_v0 = vsub.f32 %v110_v56, %v2547_v60  ;;  %v2584_v7 = vand.u32 4294901760, %v20_v1  ;;  %v2600_v11 = vand.u32 4294901760, %v29_v6 }
  0x12   :  { %313 = vmatpush.msrb.mxu2 %v2471_v20  ;;  %346 = vmatpush.msrb.mxu3 %v345_v48  ;;  %v2617_v17 = vand.u32 4294901760, %v25_v10  ;;  %vm855_vm2 = vcmask 1040384   ;;  %vm859_vm3 = vcmask 942080   ;;  %vm887_vm11 = vcmask 949248  }
  0x13   :  { %173 = vmatpush.msra.mxu1 %v172_v47  ;;  %261 = vmatpush.msrb.mxu0 %v164_v22  ;;  %v362_v57 = vsub.f32 %v2531_v51, %v361_v54  ;;  %v2612_v14 = vsub.f32 %v20_v1, %v2584_v7  ;;  %v2629_v22 = vand.u32 4294901760, %v21_v13  ;;  %vm2260_vm13 = vcmask 0  }
  0x14   :  { %315 = vmatpush.msrb.mxu2 %v2473_v21  ;;  %352 = vmatpush.msrb.mxu3 %v351_v50 }
  0x15   :  { %179 = vmatpush.msra.mxu1 %v178_v53  ;;  %265 = vmatpush.msrb.mxu0 %v170_v24  ;;  %v363_v59 = vand.u32 4294901760, %v362_v57  ;;  %v546_v26 = vand.u32 4294901760, %v2612_v14  ;;  %v2650_v30 = vsub.f32 %v21_v13, %v2629_v22 }
  0x16   :  { %181 = vmatmul.f32.vlgmr.msra.gmra.mxu1 %v2459_v15  ;;  %317 = vmatpush.msrb.mxu2 %v2480_v25 }
  0x17   :  { %288 = vmatpush.msrb.mxu1 %v2443_v8  ;;  %358 = vmatpush.msrb.mxu3 %v357_v55  ;;  %v528_v8 = vand.u32 4294901760, %v2563_v0  ;;  %v547_v34 = vsub.f32 %v2612_v14, %v546_v26  ;;  %v731_v38 = vand.u32 4294901760, %v2650_v30 }
  0x18   :  { %269 = vmatpush.msrb.mxu0 %v176_v28  ;;  %319 = vmatpush.msrb.mxu2 %v2522_v46 }
  0x19   :  { %290 = vmatpush.msrb.mxu1 %v2433_v4  ;;  %364 = vmatpush.msrb.mxu3 %v363_v59  ;;  %v2577_v4 = vsub.f32 %v28_v58, %v2554_v62  ;;  %v529_v18 = vsub.f32 %v2563_v0, %v528_v8  ;;  %v732_v43 = vsub.f32 %v2650_v30, %v731_v38 }
  0x1a   :  { %271 = vmatmul.f32.vlgmr.msrb.gmra.mxu0 %v2459_v15  ;;  %325 = vmatmul.f32.vlgmr.msrb.gmra.mxu2 %v2520_v45 }
  0x1b   :  { %366 = vmatmul.f32.vlgmr.msrb.gmra.mxu3 %v2459_v15  ;;  %292 = vmatpush.msrb.mxu1 %v2435_v5  ;;  %v2586_v5 = vand.u32 4294901760, %v113_v2  ;;  %v534_v12 = vand.u32 4294901760, %v2577_v4  ;;  %v530_v28 = vand.u32 4294901760, %v529_v18 }
  0x1c   :  { %384 = vmatpush.msra.mxu0 %v2484_v27  ;;  %442 = vmatpush.msra.mxu2 %v343_v35  ;;  %v2641_v27 = vsub.f32 %v25_v10, %v2617_v17 }
  0x1d   :  { %473 = vmatpush.msra.mxu3 %v2471_v20  ;;  %294 = vmatpush.msrb.mxu1 %v2445_v9  ;;  %v2598_v9 = vsub.f32 %v24_v63, %v2571_v3  ;;  %v2615_v16 = vsub.f32 %v113_v2, %v2586_v5  ;;  %v48_v63 = vld [vmem:[%s3960_s1 + $0x70] sm:$0xff] }
  0x1e   :  { %387 = vmatpush.msra.mxu0 %v2488_v29  ;;  %446 = vmatpush.msra.mxu2 %v349_v36  ;;  %v725_v35 = vand.u32 4294901760, %v2641_v27 }
  0x1f   :  { %475 = vmatpush.msra.mxu3 %v2473_v21  ;;  %296 = vmatmul.f32.vlgmr.msrb.gmra.mxu1 %v2459_v15  ;;  %v540_v19 = vand.u32 4294901760, %v2598_v9  ;;  %v713_v24 = vand.u32 4294901760, %v2615_v16 }
  0x20   :  { %390 = vmatpush.msra.mxu0 %v2496_v32  ;;  %413 = vmatpush.msra.mxu1 %v2471_v20  ;;  %v2627_v20 = vsub.f32 %v29_v6, %v2600_v11  ;;  %v726_v41 = vsub.f32 %v2641_v27, %v725_v35 }
  0x21   :  { %450 = vmatpush.msra.mxu2 %v355_v40  ;;  %477 = vmatpush.msra.mxu3 %v2480_v25  ;;  %v541_v29 = vsub.f32 %v2598_v9, %v540_v19  ;;  %v714_v33 = vsub.f32 %v2615_v16, %v713_v24  ;;  %v548_v40 = vand.u32 4294901760, %v547_v34 }
  0x22   :  { %393 = vmatpush.msra.mxu0 %v2531_v51  ;;  %415 = vmatpush.msra.mxu1 %v2473_v21  ;;  %v535_v21 = vsub.f32 %v2577_v4, %v534_v12  ;;  %v727_v44 = vand.u32 4294901760, %v726_v41 }
  0x23   :  { %454 = vmatpush.msra.mxu2 %v361_v54  ;;  %479 = vmatpush.msra.mxu3 %v2522_v46  ;;  %v542_v36 = vand.u32 4294901760, %v541_v29  ;;  %v715_v39 = vand.u32 4294901760, %v714_v33 }
  0x24   :  { %396 = vmatmul.f32.vlgmr.msra.gmra.mxu0 %v2477_v23  ;;  %456 = vmatmul.f32.vlgmr.msra.gmra.mxu2 %v2459_v15  ;;  %v536_v32 = vand.u32 4294901760, %v535_v21 }
  0x25   :  { %481 = vmatmul.f32.vlgmr.msra.gmra.mxu3 %v2459_v15  ;;  %417 = vmatpush.msra.mxu1 %v2480_v25  ;;  %v719_v25 = vand.u32 4294901760, %v2627_v20 }
  0x26   :  { %498 = vmatpush.msrb.mxu0 %v2547_v60  ;;  %569 = vmatpush.msrb.mxu2 %v2563_v0  ;;  %v47_v0 = vld [vmem:[%s3960_s1 + $0x68] sm:$0xff] }
  0x27   :  { %598 = vmatpush.msrb.mxu3 %v2547_v60  ;;  %419 = vmatpush.msra.mxu1 %v2522_v46  ;;  %v720_v37 = vsub.f32 %v2627_v20, %v719_v25  ;;  %v733_v46 = vand.u32 4294901760, %v732_v43  ;;  %v2720_v6 = vand.u32 4294901760, %v47_v0  ;;  %v40_v43 = vld [vmem:[%s3960_s1 + $0x30] sm:$0xff] }
  0x28   :  { %500 = vmatpush.msrb.mxu0 %v2554_v62  ;;  %572 = vmatpush.msrb.mxu2 %v2577_v4  ;;  %v2718_v4 = vand.u32 4294901760, %v48_v63 }
  0x29   :  { %600 = vmatpush.msrb.mxu3 %v2554_v62  ;;  %423 = vmatmul.f32.vlgmr.msra.gmra.mxu1 %v2493_v31  ;;  %v721_v42 = vand.u32 4294901760, %v720_v37 }
  0x2a   :  { %502 = vmatpush.msrb.mxu0 %v2571_v3  ;;  %531 = vmatpush.msrb.mxu1 %v530_v28  ;;  %v2744_v18 = vsub.f32 %v48_v63, %v2718_v4 }
  0x2b   :  { %575 = vmatpush.msrb.mxu2 %v2598_v9  ;;  %602 = vmatpush.msrb.mxu3 %v2571_v3 }
  0x2c   :  { %504 = vmatpush.msrb.mxu0 %v2584_v7  ;;  %537 = vmatpush.msrb.mxu1 %v536_v32  ;;  %v3974_v29 = vand.u32 4294901760, %v2744_v18 }
  0x2d   :  { %578 = vmatpush.msrb.mxu2 %v2612_v14  ;;  %604 = vmatpush.msrb.mxu3 %v2584_v7  ;;  %v43_v14 = vld [vmem:[%s3960_s1 + $0x48] sm:$0xff] }
  0x2e   :  { %510 = vmatmul.f32.vlgmr.msrb.gmra.mxu0 %v2520_v45  ;;  %581 = vmatmul.f32.vlgmr.msrb.gmra.mxu2 %v2477_v23  ;;  %v944_v37 = vsub.f32 %v2744_v18, %v3974_v29 }
  0x2f   :  { %608 = vmatmul.f32.vlgmr.msrb.gmra.mxu3 %v2493_v31  ;;  %543 = vmatpush.msrb.mxu1 %v542_v36 }
  0x30   :  { %627 = vmatpush.msra.mxu0 %v528_v8  ;;  %683 = vmatpush.msra.mxu2 %v2586_v5  ;;  %v44_v8 = vld [vmem:[%s3960_s1 + $0x50] sm:$0xff] }
  0x31   :  { %716 = vmatpush.msra.mxu3 %v715_v39  ;;  %549 = vmatpush.msrb.mxu1 %v548_v40  ;;  %v2735_v13 = vand.u32 4294901760, %v44_v8  ;;  %v42_v39 = vld [vmem:[%s3960_s1 + $0x40] sm:$0xff] }
  0x32   :  { %631 = vmatpush.msra.mxu0 %v534_v12  ;;  %685 = vmatpush.msra.mxu2 %v2600_v11 }
  0x33   :  { %722 = vmatpush.msra.mxu3 %v721_v42  ;;  %551 = vmatmul.f32.vlgmr.msrb.gmra.mxu1 %v2459_v15  ;;  %v41_v42 = vld [vmem:[%s3960_s1 + $0x38] sm:$0xff] }
  0x34   :  { %635 = vmatpush.msra.mxu0 %v540_v19  ;;  %658 = vmatpush.msra.mxu1 %v2547_v60  ;;  %v2747_v19 = vsub.f32 %v47_v0, %v2720_v6 }
  0x35   :  { %687 = vmatpush.msra.mxu2 %v2617_v17  ;;  %728 = vmatpush.msra.mxu3 %v727_v44  ;;  %v39_v44 = vld [vmem:[%s3960_s1 + $0x28] sm:$0xff] }
  0x36   :  { %639 = vmatpush.msra.mxu0 %v546_v26  ;;  %660 = vmatpush.msra.mxu1 %v2554_v62  ;;  %v49_v62 = vld [vmem:[%s3960_s1 + $0x78] sm:$0xff]  ;;  %v2760_v26 = vsub.f32 %v44_v8, %v2735_v13 }
  0x37   :  { %689 = vmatpush.msra.mxu2 %v2629_v22  ;;  %734 = vmatpush.msra.mxu3 %v733_v46 }
  0x38   :  { %641 = vmatmul.f32.vlgmr.msra.gmra.mxu0 %v2459_v15  ;;  %695 = vmatmul.f32.vlgmr.msra.gmra.mxu2 %v2520_v45  ;;  %v3970_v41 = vand.u32 4294901760, %v2760_v26 }
  0x39   :  { %736 = vmatmul.f32.vlgmr.msra.gmra.mxu3 %v2459_v15  ;;  %662 = vmatpush.msra.mxu1 %v2571_v3  ;;  %v2716_v3 = vand.u32 4294901760, %v49_v62 }
  0x3a   :  { %754 = vmatpush.msrb.mxu0 %v2615_v16  ;;  %812 = vmatpush.msrb.mxu2 %v713_v24 }
  0x3b   :  { %664 = vmatpush.msra.mxu1 %v2584_v7  ;;  %843 = vmatpush.msrb.mxu3 %v2586_v5  ;;  %v46_v7 = vld [vmem:[%s3960_s1 + $0x60] sm:$0xff] }
  0x3c   :  { %757 = vmatpush.msrb.mxu0 %v2627_v20  ;;  %816 = vmatpush.msrb.mxu2 %v719_v25  ;;  %v2751_v20 = vand.u32 4294901760, %v43_v14  ;;  %v3973_v25 = vand.u32 4294901760, %v2747_v19 }
  0x3d   :  { %666 = vmatmul.f32.vlgmr.msra.gmra.mxu1 %v2459_v15  ;;  %845 = vmatpush.msrb.mxu3 %v2600_v11 }
  0x3e   :  { %760 = vmatpush.msrb.mxu0 %v2641_v27  ;;  %783 = vmatpush.msrb.mxu1 %v2586_v5  ;;  %v45_v5 = vld [vmem:[%s3960_s1 + $0x58] sm:$0xff] }
  0x3f   :  { %820 = vmatpush.msrb.mxu2 %v725_v35  ;;  %847 = vmatpush.msrb.mxu3 %v2617_v17  ;;  %v2733_v12 = vand.u32 4294901760, %v45_v5  ;;  %v2773_v35 = vsub.f32 %v43_v14, %v2751_v20 }
  0x40   :  { %763 = vmatpush.msrb.mxu0 %v2650_v30  ;;  %785 = vmatpush.msrb.mxu1 %v2600_v11  ;;  %v2731_v11 = vand.u32 4294901760, %v46_v7 }
  0x41   :  { %824 = vmatpush.msrb.mxu2 %v731_v38  ;;  %766 = vmatmul.f32.vlgmr.msrb.gmra.mxu0 %v2477_v23  ;;  %v2757_v24 = vsub.f32 %v45_v5, %v2733_v12  ;;  %v950_v38 = vsub.f32 %v2747_v19, %v3973_v25 }
  0x42   :  { %826 = vmatmul.f32.vlgmr.msrb.gmra.mxu2 %v2459_v15  ;;  %787 = vmatpush.msrb.mxu1 %v2617_v17  ;;  %v2741_v17 = vsub.f32 %v49_v62, %v2716_v3  ;;  %v2754_v21 = vsub.f32 %v46_v7, %v2731_v11  ;;  %v36_v62 = vld [vmem:[%s3960_s1 + $0x10] sm:$0xff] }
  0x43   :  { %849 = vmatpush.msrb.mxu3 %v2629_v22  ;;  %895 = vmatpush.msra.mxu0 %v2716_v3  ;;  %v3971_v34 = vand.u32 4294901760, %v2757_v24 }
  0x44   :  { %851 = vmatmul.f32.vlgmr.msrb.gmra.mxu3 %v2459_v15  ;;  %789 = vmatpush.msrb.mxu1 %v2629_v22  ;;  %v3976_v28 = vand.u32 4294901760, %v2741_v17  ;;  %v3972_v33 = vand.u32 4294901760, %v2754_v21 }
  0x45   :  { %793 = vmatmul.f32.vlgmr.msrb.gmra.mxu1 %v2493_v31  ;;  %1091 = vmatpush.msra.mxu3 %v2716_v3 }
  0x46   :  { %1038 = vmatpush.msra.mxu2 %v2741_v17  ;;  %897 = vmatpush.msra.mxu0 %v2718_v4  ;;  %v938_v36 = vsub.f32 %v2741_v17, %v3976_v28 }
  0x47   :  { %1093 = vmatpush.msra.mxu3 %v2718_v4 }
  0x48   :  { %1041 = vmatpush.msra.mxu2 %v2744_v18  ;;  %899 = vmatpush.msra.mxu0 %v2720_v6 }
  0x49   :  { %1095 = vmatpush.msra.mxu3 %v2720_v6 }
  0x4a   :  { %1044 = vmatpush.msra.mxu2 %v2747_v19  ;;  %901 = vmatpush.msra.mxu0 %v2731_v11 }
  0x4b   :  { %1097 = vmatpush.msra.mxu3 %v2731_v11 }
  0x4c   :  { %1047 = vmatpush.msra.mxu2 %v2754_v21  ;;  %903 = vmatpush.msra.mxu0 %v2733_v12 }
  0x4d   :  { %1099 = vmatpush.msra.mxu3 %v2733_v12 }
  0x4e   :  { %1050 = vmatpush.msra.mxu2 %v2757_v24  ;;  %905 = vmatpush.msra.mxu0 %v2735_v13 }
  0x4f   :  { %1101 = vmatpush.msra.mxu3 %v2735_v13 }
  0x50   :  { %1053 = vmatpush.msra.mxu2 %v2760_v26  ;;  %907 = vmatpush.msra.mxu0 %v2751_v20 }
  0x51   :  { %1103 = vmatpush.msra.mxu3 %v2751_v20 }
  0x52   :  { %1056 = vmatpush.msra.mxu2 %v2773_v35 }
  0x8e   :  { %v141_v45 = vpop.f32.mrf.mxu0 }
  0x93   :  { %v182_v47 = vpop.f32.mrf.mxu1  ;;  %v212_v48 = vpop.f32.mrf.mxu2 }
  0x94   :  { %v239_v49 = vpop.f32.mrf.mxu3  ;;  %v183_v56 = vadd.f32 %v182_v47, %v141_v45  ;;  %v939_v45 = vand.u32 4294901760, %v938_v36  ;;  %v945_v47 = vand.u32 4294901760, %v944_v37 }
  0x96   :  { %v213_v59 = vadd.f32 %v212_v48, %v183_v56  ;;  %v956_v48 = vsub.f32 %v2754_v21, %v3972_v33  ;;  %940 = vmatpush.msra.mxu1 %v939_v45  ;;  %v2825_v56 = vand.u32 4294901760, %v40_v43 }
  0x97   :  { %v272_v50 = vpop.f32.mrf.mxu0 }
  0x98   :  { %v240_v31 = vadd.f32 %v239_v49, %v213_v59  ;;  %v38_v49 = vld [vmem:[%s3960_s1 + $0x20] sm:$0xff]  ;;  %946 = vmatpush.msra.mxu1 %v945_v47  ;;  %v957_v0 = vand.u32 4294901760, %v956_v48 }
  0x9a   :  { %v273_v27 = vadd.f32 %v272_v50, %v240_v31  ;;  %v2840_v31 = vand.u32 4294901760, %v38_v49 }
  0x9c   :  { %v2705_v51 = vpop.f32.mrf.mxu1 }
  0x9d   :  { %v326_v23 = vpop.f32.mrf.mxu2  ;;  %v2801_v46 = vadd.f32 %v2705_v51, %v273_v27  ;;  %v962_v51 = vsub.f32 %v2757_v24, %v3971_v34 }
  0x9e   :  { %v367_v52 = vpop.f32.mrf.mxu3 }
  0x9f   :  { %v368_v54 = vadd.f32 %v367_v52, %v326_v23  ;;  %v3968_v23 = vand.u32 4294901760, %v2773_v35  ;;  %v2820_v52 = vand.u32 4294901760, %v42_v39  ;;  %v2872_v36 = vsel %vm855_vm2, %v2801_v46, -inf }
  0xa1   :  { %v397_v53 = vpop.f32.mrf.mxu0  ;;  %1105 = vmatpush.msra.mxu3 %v2820_v52  ;;  %909 = vmatpush.msra.mxu0 %v2820_v52 }
  0xa2   :  { %v398_v15 = vadd.f32 %v397_v53, %v368_v54  ;;  %v951_v54 = vand.u32 4294901760, %v950_v38 }
  0xa4   :  { %952 = vmatpush.msra.mxu1 %v951_v54  ;;  %v64_v54 = vld [vmem:[%s3960_s1 + $0xf0] sm:$0xff] }
  0xa6   :  { %v424_v55 = vpop.f32.mrf.mxu1  ;;  %958 = vmatpush.msra.mxu1 %v957_v0 }
  0xa7   :  { %v457_v57 = vpop.f32.mrf.mxu2  ;;  %v425_v61 = vadd.f32 %v424_v55, %v398_v15  ;;  %v2823_v55 = vand.u32 4294901760, %v41_v42 }
  0xa8   :  { %v482_v58 = vpop.f32.mrf.mxu3 }
  0xa9   :  { %v458_v1 = vadd.f32 %v457_v57, %v425_v61  ;;  %v2827_v57 = vand.u32 4294901760, %v39_v44  ;;  %v2837_v61 = vsub.f32 %v42_v39, %v2820_v52  ;;  %v35_v39 = vld [vmem:[%s3960_s1 + $0x8] sm:$0xff]  ;;  %1107 = vmatpush.msra.mxu3 %v2823_v55  ;;  %911 = vmatpush.msra.mxu0 %v2823_v55 }
  0xaa   :  { %v2913_v0 = vand.u32 4294901760, %v35_v39 }
  0xab   :  { %v511_v60 = vpop.f32.mrf.mxu0  ;;  %v2767_v30 = vadd.f32 %v482_v58, %v458_v1  ;;  %v37_v58 = vld [vmem:[%s3960_s1 + $0x18] sm:$0xff]  ;;  %v2847_v1 = vsub.f32 %v41_v42, %v2823_v55  ;;  %v2853_v7 = vsub.f32 %v39_v44, %v2827_v57  ;;  %v3967_v8 = vand.u32 4294901760, %v2837_v61  ;;  %1059 = vmatpush.msra.mxu2 %v2837_v61  ;;  %1109 = vmatpush.msra.mxu3 %v2825_v56 }
  0xac   :  { %913 = vmatpush.msra.mxu0 %v2825_v56 }
  0xad   :  { %v2813_v50 = vsel %vm855_vm2, %v2767_v30, -inf  ;;  %v3966_v27 = vand.u32 4294901760, %v2847_v1  ;;  %v3964_v38 = vand.u32 4294901760, %v2853_v7  ;;  %1062 = vmatpush.msra.mxu2 %v2847_v1  ;;  %1111 = vmatpush.msra.mxu3 %v2827_v57 }
  0xae   :  { %915 = vmatpush.msra.mxu0 %v2827_v57 }
  0xaf   :  { %v2890_v45 = vsub.f32 %v2847_v1, %v3966_v27  ;;  %1113 = vmatpush.msra.mxu3 %v2840_v31 }
  0xb0   :  { %v552_v2 = vpop.f32.mrf.mxu1  ;;  %917 = vmatpush.msra.mxu0 %v2840_v31 }
  0xb1   :  { %v553_v10 = vadd.f32 %v552_v2, %v511_v60  ;;  %v582_v9 = vpop.f32.mrf.mxu2  ;;  %v968_v60 = vsub.f32 %v2760_v26, %v3970_v41  ;;  %v2850_v2 = vsub.f32 %v40_v43, %v2825_v56  ;;  %v980_v43 = vsub.f32 %v2837_v61, %v3967_v8  ;;  %v61_v8 = vld [vmem:[%s3960_s1 + $0xd8] sm:$0xff] }
  0xb2   :  { %v609_v16 = vpop.f32.mrf.mxu3  ;;  %v2980_v29 = vand.u32 4294901760, %v61_v8 }
  0xb3   :  { %v583_v22 = vadd.f32 %v582_v9, %v553_v10  ;;  %v2859_v10 = vsub.f32 %v38_v49, %v2840_v31  ;;  %v2861_v9 = vand.u32 4294901760, %v37_v58  ;;  %v3965_v37 = vand.u32 4294901760, %v2850_v2  ;;  %v34_v49 = vld [vmem:[%s3960_s1] sm:$0xff]  ;;  %1065 = vmatpush.msra.mxu2 %v2850_v2 }
  0xb4   :  { %v969_v42 = vand.u32 4294901760, %v968_v60 }
  0xb5   :  { %v642_v32 = vpop.f32.mrf.mxu0  ;;  %v610_v40 = vadd.f32 %v609_v16, %v583_v22  ;;  %v963_v16 = vand.u32 4294901760, %v962_v51  ;;  %v974_v22 = vsub.f32 %v2773_v35, %v3968_v23  ;;  %v3969_v47 = vand.u32 4294901760, %v2859_v10  ;;  %v65_v51 = vld [vmem:[%s3960_s1 + $0xf8] sm:$0xff]  ;;  %1068 = vmatpush.msra.mxu2 %v2853_v7  ;;  %1115 = vmatpush.msra.mxu3 %v2861_v9 }
  0xb6   :  { %v2896_v48 = vsub.f32 %v37_v58, %v2861_v9  ;;  %919 = vmatpush.msra.mxu0 %v2861_v9 }
  0xb7   :  { %v643_v15 = vadd.f32 %v642_v32, %v610_v40  ;;  %v2868_v32 = vand.u32 4294901760, %v36_v62  ;;  %964 = vmatpush.msra.mxu1 %v963_v16  ;;  %v981_v16 = vand.u32 4294901760, %v980_v43  ;;  %v2942_v27 = vsub.f32 %v2859_v10, %v3969_v47  ;;  %1071 = vmatpush.msra.mxu2 %v2859_v10 }
  0xb9   :  { %v2911_v58 = vsub.f32 %v36_v62, %v2868_v32  ;;  %v62_v62 = vld [vmem:[%s3960_s1 + $0xe0] sm:$0xff]  ;;  %970 = vmatpush.msra.mxu1 %v969_v42  ;;  %v3975_v42 = vand.u32 4294901760, %v2896_v48  ;;  %1074 = vmatpush.msra.mxu2 %v2896_v48 }
  0xba   :  { %v667_v53 = vpop.f32.mrf.mxu1  ;;  %v2959_v41 = vand.u32 4294901760, %v62_v62  ;;  %1117 = vmatpush.msra.mxu3 %v2868_v32  ;;  %921 = vmatpush.msra.mxu0 %v2868_v32 }
  0xbb   :  { %v696_v59 = vpop.f32.mrf.mxu2  ;;  %1077 = vmatpush.msra.mxu2 %v2911_v58 }
  0xbc   :  { %v737_v63 = vpop.f32.mrf.mxu3  ;;  %1119 = vmatpush.msra.mxu3 %v2913_v0  ;;  %923 = vmatpush.msra.mxu0 %v2913_v0 }
  0xbd   :  { %v738_v5 = vadd.f32 %v737_v63, %v696_v59  ;;  %v2907_v59 = vadd.f32 %v667_v53, %v643_v15  ;;  %v975_v63 = vand.u32 4294901760, %v974_v22  ;;  %v992_v53 = vsub.f32 %v2850_v2, %v3965_v37 }
  0xbe   :  { %v767_v14 = vpop.f32.mrf.mxu0  ;;  %v2924_v15 = vsub.f32 %v2853_v7, %v3964_v38  ;;  %v2932_v22 = vand.u32 4294901760, %v34_v49  ;;  %v987_v37 = vand.u32 4294901760, %v2890_v45  ;;  %v2954_v45 = vsub.f32 %v35_v39, %v2913_v0  ;;  %v60_v39 = vld [vmem:[%s3960_s1 + $0xd0] sm:$0xff] }
  0xbf   :  { %v768_v44 = vadd.f32 %v767_v14, %v738_v5  ;;  %v63_v5 = vld [vmem:[%s3960_s1 + $0xe8] sm:$0xff]  ;;  %976 = vmatpush.msra.mxu1 %v975_v63  ;;  %v993_v33 = vand.u32 4294901760, %v992_v53  ;;  %v3001_v28 = vand.u32 4294901760, %v60_v39 }
  0xc0   :  { %v2947_v43 = vand.u32 4294901760, %v63_v5  ;;  %1080 = vmatpush.msra.mxu2 %v2954_v45  ;;  %1121 = vmatpush.msra.mxu3 %v2932_v22 }
  0xc1   :  { %982 = vmatpush.msra.mxu1 %v981_v16  ;;  %925 = vmatpush.msra.mxu0 %v2932_v22 }
  0xc2   :  { %v794_v60 = vpop.f32.mrf.mxu1  ;;  %v2968_v63 = vsub.f32 %v63_v5, %v2947_v43  ;;  %v999_v5 = vand.u32 4294901760, %v2924_v15  ;;  %v4010_v15 = vand.u32 4294901760, %v2911_v58 }
  0xc3   :  { %v795_v14 = vadd.f32 %v794_v60, %v768_v44  ;;  %v2934_v44 = vand.u32 4294901760, %v65_v51  ;;  %v2936_v60 = vand.u32 4294901760, %v64_v54  ;;  %988 = vmatpush.msra.mxu1 %v987_v37 }
  0xc5   :  { %v827_v38 = vpop.f32.mrf.mxu2  ;;  %v2957_v47 = vsub.f32 %v65_v51, %v2934_v44  ;;  %994 = vmatpush.msra.mxu1 %v993_v33 }
  0xc6   :  { %v828_v23 = vadd.f32 %v827_v38, %v795_v14  ;;  %v2965_v38 = vsub.f32 %v64_v54, %v2936_v60  ;;  %v2977_v14 = vsub.f32 %v34_v49, %v2932_v22  ;;  %v858_v54 = vsel %vm855_vm2, %v2907_v59, -inf  ;;  %v59_v49 = vld [vmem:[%s3960_s1 + $0xc8] sm:$0xff] }
  0xc7   :  { %4008 = vst [vmem:[#allocation8_spill] sm:$0xff] %v2957_v47  ;;  %v852_v34 = vpop.f32.mrf.mxu3  ;;  %v3979_v53 = vand.u32 4294901760, %v2957_v47  ;;  %1000 = vmatpush.msra.mxu1 %v999_v5 }
  0xc8   :  { %v2973_v51 = vadd.f32 %v852_v34, %v828_v23  ;;  %v1010_v34 = vsub.f32 %v2896_v48, %v3975_v42  ;;  %v2999_v42 = vsub.f32 %v62_v62, %v2959_v41  ;;  %v1005_v23 = vand.u32 4294901760, %v2942_v27  ;;  %1083 = vmatpush.msra.mxu2 %v2977_v14 }
  0xc9   :  { %v1279_v37 = vsub.f32 %v2957_v47, %v3979_v53  ;;  %v1016_v62 = vsub.f32 %v2911_v58, %v4010_v15  ;;  %v3016_v27 = vsub.f32 %v61_v8, %v2980_v29  ;;  %v4012_v33 = vand.u32 4294901760, %v2965_v38 }
  0xca   :  { %4009 = vst [vmem:[#allocation9_spill] sm:$0xff] %v2973_v51  ;;  %v860_v16 = vsel %vm859_vm3, %v2973_v51, -inf  ;;  %v4011_v51 = vmax.f32 %v2872_v36, %v2813_v50  ;;  %v1011_v25 = vand.u32 4294901760, %v1010_v34  ;;  %v1296_v47 = vand.u32 4294901760, %v2999_v42  ;;  %1006 = vmatpush.msra.mxu1 %v1005_v23  ;;  %1236 = vmatpush.msrb.mxu2 %v2934_v44 }
  0xcb   :  { %v862_v40 = vmax.f32 %v858_v54, %v860_v16  ;;  %v3018_v16 = vand.u32 4294901760, %v59_v49  ;;  %v1285_v15 = vsub.f32 %v2965_v38, %v4012_v33  ;;  %v4013_v54 = vand.u32 4294901760, %v2954_v45 }
  0xcc   :  { %v3034_v50 = vsub.f32 %v60_v39, %v3001_v28  ;;  %v1280_v36 = vand.u32 4294901760, %v1279_v37  ;;  %v1017_v5 = vand.u32 4294901760, %v1016_v62  ;;  %v4015_v34 = vand.u32 4294901760, %v2977_v14  ;;  %1012 = vmatpush.msra.mxu1 %v1011_v25  ;;  %1238 = vmatpush.msrb.mxu2 %v2936_v60 }
  0xcd   :  { %v863_v53 = vmax.f32 %v4011_v51, %v862_v40  ;;  %v1022_v8 = vsub.f32 %v2954_v45, %v4013_v54  ;;  %v4014_v40 = vand.u32 4294901760, %v2968_v63  ;;  %v1302_v33 = vand.u32 4294901760, %v3016_v27 }
  0xce   :  { %v1028_v54 = vsub.f32 %v2977_v14, %v4015_v34  ;;  %v3046_v39 = vsub.f32 %v59_v49, %v3018_v16  ;;  %v1297_v23 = vsub.f32 %v2999_v42, %v1296_v47  ;;  %v1308_v62 = vand.u32 4294901760, %v3034_v50  ;;  %1281 = vmatpush.msrb.mxu3 %v1280_v36  ;;  %1018 = vmatpush.msra.mxu1 %v1017_v5 }
  0xcf   :  { %864 = vmax.xlane.f32.xlu0 %v863_v53  ;;  %v1291_v51 = vsub.f32 %v2968_v63, %v4014_v40  ;;  %v1286_v53 = vand.u32 4294901760, %v1285_v15  ;;  %v1023_v37 = vand.u32 4294901760, %v1022_v8  ;;  %v1303_v25 = vsub.f32 %v3016_v27, %v1302_v33  ;;  %1240 = vmatpush.msrb.mxu2 %v2947_v43 }
  0xd0   :  { %v1029_v40 = vand.u32 4294901760, %v1028_v54  ;;  %v1314_v15 = vand.u32 4294901760, %v3046_v39  ;;  %v4016_v8 = vand.u32 4294901760, %v2741_v17  ;;  %v1298_v34 = vand.u32 4294901760, %v1297_v23 }
  0xd1   :  { %v1292_v49 = vand.u32 4294901760, %v1291_v51  ;;  %1287 = vmatpush.msrb.mxu3 %v1286_v53  ;;  %1024 = vmatpush.msra.mxu1 %v1023_v37  ;;  %v1309_v36 = vsub.f32 %v3034_v50, %v1308_v62  ;;  %v4017_v51 = vand.u32 4294901760, %v2744_v18  ;;  %v1304_v5 = vand.u32 4294901760, %v1303_v25  ;;  %v58_v37 = vld [vmem:[%s3960_s1 + $0xc0] sm:$0xff] }
  0xd2   :  { %1132 = vmatpush.msrb.mxu0 %v4016_v8  ;;  %v1315_v54 = vsub.f32 %v3046_v39, %v1314_v15  ;;  %1242 = vmatpush.msrb.mxu2 %v2959_v41  ;;  %v4018_v17 = vand.u32 4294901760, %v2747_v19  ;;  %v4019_v18 = vand.u32 4294901760, %v2754_v21  ;;  %v4020_v19 = vand.u32 4294901760, %v2757_v24 }
  0xd3   :  { %1293 = vmatpush.msrb.mxu3 %v1292_v49  ;;  %1030 = vmatpush.msra.mxu1 %v1029_v40  ;;  %v1310_v53 = vand.u32 4294901760, %v1309_v36  ;;  %v4021_v21 = vand.u32 4294901760, %v2760_v26  ;;  %v4023_v24 = vand.u32 4294901760, %v2837_v61  ;;  %v4025_v26 = vand.u32 4294901760, %v2850_v2  ;;  %v53_v40 = vld [vmem:[%s3960_s1 + $0x98] sm:$0xff] }
  0xd4   :  { %1136 = vmatpush.msrb.mxu0 %v4017_v51  ;;  %1244 = vmatpush.msrb.mxu2 %v2980_v29 }
  0xd5   :  { %1199 = vmatpush.msrb.mxu1 %v2716_v3  ;;  %1299 = vmatpush.msrb.mxu3 %v1298_v34  ;;  %v1316_v3 = vand.u32 4294901760, %v1315_v54  ;;  %v3178_v34 = vand.u32 4294901760, %v53_v40 }
  0xd6   :  { %1140 = vmatpush.msrb.mxu0 %v4018_v17  ;;  %1246 = vmatpush.msrb.mxu2 %v3001_v28 }
  0xd7   :  { %1201 = vmatpush.msrb.mxu1 %v2718_v4  ;;  %1305 = vmatpush.msrb.mxu3 %v1304_v5  ;;  %v3090_v4 = vand.u32 4294901760, %v58_v37  ;;  %v52_v5 = vld [vmem:[%s3960_s1 + $0x90] sm:$0xff] }
  0xd8   :  { %1144 = vmatpush.msrb.mxu0 %v4019_v18  ;;  %1248 = vmatpush.msrb.mxu2 %v3018_v16  ;;  %v3192_v18 = vsub.f32 %v53_v40, %v3178_v34 }
  0xd9   :  { %1203 = vmatpush.msrb.mxu1 %v2720_v6  ;;  %1311 = vmatpush.msrb.mxu3 %v1310_v53  ;;  %v4022_v6 = vand.u32 4294901760, %v2773_v35  ;;  %v4029_v35 = vand.u32 4294901760, %v2911_v58  ;;  %v3133_v61 = vsub.f32 %v58_v37, %v3090_v4  ;;  %v3189_v53 = vand.u32 4294901760, %v52_v5 }
  0xda   :  { %1148 = vmatpush.msrb.mxu0 %v4020_v19  ;;  %1250 = vmatpush.msrb.mxu2 %v3090_v4  ;;  %v1350_v19 = vand.u32 4294901760, %v3192_v18 }
  0xdb   :  { %1205 = vmatpush.msrb.mxu1 %v2731_v11  ;;  %1317 = vmatpush.msrb.mxu3 %v1316_v3  ;;  %v4024_v11 = vand.u32 4294901760, %v2847_v1  ;;  %v1320_v1 = vand.u32 4294901760, %v3133_v61 }
  0xdc   :  { %1152 = vmatpush.msrb.mxu0 %v4021_v21 }
  0xdd   :  { %1207 = vmatpush.msrb.mxu1 %v2733_v12  ;;  %v4026_v12 = vand.u32 4294901760, %v2853_v7 }
  0xde   :  { %1156 = vmatpush.msrb.mxu0 %v4022_v6  ;;  %v51_v6 = vld [vmem:[%s3960_s1 + $0x88] sm:$0xff] }
  0xdf   :  { %1209 = vmatpush.msrb.mxu1 %v2735_v13  ;;  %v4027_v13 = vand.u32 4294901760, %v2859_v10  ;;  %v55_v10 = vld [vmem:[%s3960_s1 + $0xa8] sm:$0xff] }
  0xe0   :  { %1160 = vmatpush.msrb.mxu0 %v4023_v24 }
  0xe1   :  { %1211 = vmatpush.msrb.mxu1 %v2751_v20  ;;  %v4028_v20 = vand.u32 4294901760, %v2896_v48  ;;  %v3153_v48 = vand.u32 4294901760, %v55_v10 }
  0xe2   :  { %1164 = vmatpush.msrb.mxu0 %v4024_v11  ;;  %v1351_v11 = vsub.f32 %v3192_v18, %v1350_v19 }
  0xe3   :  { %1213 = vmatpush.msrb.mxu1 %v2820_v52  ;;  %v4030_v52 = vand.u32 4294901760, %v2954_v45  ;;  %v3169_v49 = vsub.f32 %v55_v10, %v3153_v48 }
  0xe4   :  { %1168 = vmatpush.msrb.mxu0 %v4025_v26  ;;  %v3208_v26 = vand.u32 4294901760, %v51_v6 }
  0xe5   :  { %1215 = vmatpush.msrb.mxu1 %v2823_v55  ;;  %v4031_v55 = vand.u32 4294901760, %v2977_v14  ;;  %v1338_v51 = vand.u32 4294901760, %v3169_v49 }
  0xe6   :  { %1172 = vmatpush.msrb.mxu0 %v4026_v12  ;;  %v3211_v12 = vsub.f32 %v52_v5, %v3189_v53 }
  0xe7   :  { %1217 = vmatpush.msrb.mxu1 %v2825_v56  ;;  %v57_v56 = vld [vmem:[%s3960_s1 + $0xb8] sm:$0xff]  ;;  %v1339_v37 = vsub.f32 %v3169_v49, %v1338_v51 }
  0xe8   :  { %1176 = vmatpush.msrb.mxu0 %v4027_v13  ;;  %v50_v13 = vld [vmem:[%s3960_s1 + $0x80] sm:$0xff] }
  0xe9   :  { %1219 = vmatpush.msrb.mxu1 %v2827_v57  ;;  %v3130_v57 = vand.u32 4294901760, %v57_v56  ;;  %v1340_v21 = vand.u32 4294901760, %v1339_v37 }
  0xea   :  { %1180 = vmatpush.msrb.mxu0 %v4028_v20  ;;  %v1352_v20 = vand.u32 4294901760, %v1351_v11  ;;  %v4032_v11 = vld [vmem:[#allocation9_spill] sm:$0xff] }
  0xeb   :  { %1221 = vmatpush.msrb.mxu1 %v2840_v31  ;;  %v56_v31 = vld [vmem:[%s3960_s1 + $0xb0] sm:$0xff]  ;;  %1252 = vmatpush.msrb.mxu2 %v3130_v57  ;;  %v3143_v7 = vsub.f32 %v57_v56, %v3130_v57 }
  0xec   :  { %1184 = vmatpush.msrb.mxu0 %v4029_v35  ;;  %v3140_v2 = vand.u32 4294901760, %v56_v31  ;;  %v1356_v35 = vand.u32 4294901760, %v3211_v12 }
  0xed   :  { %1223 = vmatpush.msrb.mxu1 %v2861_v9  ;;  %v1321_v9 = vsub.f32 %v3133_v61, %v1320_v1 }
  0xee   :  { %1188 = vmatpush.msrb.mxu0 %v4030_v52  ;;  %1254 = vmatpush.msrb.mxu2 %v3140_v2  ;;  %v3156_v58 = vsub.f32 %v56_v31, %v3140_v2  ;;  %v3218_v52 = vand.u32 4294901760, %v50_v13  ;;  %v1357_v56 = vsub.f32 %v3211_v12, %v1356_v35 }
  0xef   :  { %1225 = vmatpush.msrb.mxu1 %v2868_v32  ;;  %v1326_v32 = vand.u32 4294901760, %v3143_v7 }
  0xf0   :  { %1192 = vmatpush.msrb.mxu0 %v4031_v55  ;;  %1256 = vmatpush.msrb.mxu2 %v3153_v48  ;;  %v1332_v14 = vand.u32 4294901760, %v3156_v58  ;;  %v3221_v55 = vsub.f32 %v51_v6, %v3208_v26  ;;  %v3229_v10 = vsub.f32 %v50_v13, %v3218_v52 }
  0xf1   :  { %1227 = vmatpush.msrb.mxu1 %v2913_v0  ;;  %v54_v0 = vld [vmem:[%s3960_s1 + $0xa0] sm:$0xff]  ;;  %v1327_v45 = vsub.f32 %v3143_v7, %v1326_v32 }
  0xf2   :  { %v3166_v23 = vand.u32 4294901760, %v54_v0  ;;  %v1333_v8 = vsub.f32 %v3156_v58, %v1332_v14  ;;  %v1362_v31 = vand.u32 4294901760, %v3221_v55 }
  0xf3   :  { %1229 = vmatpush.msrb.mxu1 %v2932_v22  ;;  %v1322_v22 = vand.u32 4294901760, %v1321_v9  ;;  %v1328_v25 = vand.u32 4294901760, %v1327_v45  ;;  %v1358_v9 = vand.u32 4294901760, %v1357_v56 }
  0xf4   :  { %1258 = vmatpush.msrb.mxu2 %v3166_v23  ;;  %v3181_v36 = vsub.f32 %v54_v0, %v3166_v23  ;;  %v1334_v54 = vand.u32 4294901760, %v1333_v8  ;;  %v1363_v0 = vsub.f32 %v3221_v55, %v1362_v31  ;;  %v2262_v8 = vlaneseq }
  0xf5   :  { %1323 = vmatpush.msrb.mxu3 %v1322_v22  ;;  %v3982_v22 = vand.u32 4294901760, %v3229_v10 }
  0xf6   :  { %1260 = vmatpush.msrb.mxu2 %v3178_v34  ;;  %v1344_v17 = vand.u32 4294901760, %v3181_v36  ;;  %v1364_v45 = vand.u32 4294901760, %v1363_v0  ;;  %v2263_v5 = vand.u32 127, %v2262_v8 }
  0xf7   :  { %1329 = vmatpush.msrb.mxu3 %v1328_v25  ;;  %v1369_v40 = vsub.f32 %v3229_v10, %v3982_v22 }
  0xf8   :  { %v1345_v3 = vsub.f32 %v3181_v36, %v1344_v17  ;;  %1262 = vmatpush.msrb.mxu2 %v3189_v53  ;;  %v2265_v37 = vadd.s32 256, %v2263_v5 }
  0xf9   :  { %1335 = vmatpush.msrb.mxu3 %v1334_v54  ;;  %v1370_v25 = vand.u32 4294901760, %v1369_v40  ;;  %v2264_v54 = vadd.s32 128, %v2263_v5 }
  0xfa   :  { %v1346_v24 = vand.u32 4294901760, %v1345_v3  ;;  %1264 = vmatpush.msrb.mxu2 %v3208_v26  ;;  %v2266_v3 = vadd.s32 384, %v2263_v5 }
  0xfb   :  { %1341 = vmatpush.msrb.mxu3 %v1340_v21 }
  0xfc   :  { %1266 = vmatpush.msrb.mxu2 %v3218_v52 }
  0xfd   :  { %1347 = vmatpush.msrb.mxu3 %v1346_v24 }
  0xff   :  { %1353 = vmatpush.msrb.mxu3 %v1352_v20 }
 0x101   :  { %1359 = vmatpush.msrb.mxu3 %v1358_v9 }
 0x103   :  { %1365 = vmatpush.msrb.mxu3 %v1364_v45 }
 0x105   :  { %1371 = vmatpush.msrb.mxu3 %v1370_v25 }
 0x142   :  { %v865_v21 = vpop.xlane.xlu0 %864 }
 0x143   :  { %v866_v6 = vsub.f32 %v2801_v46, %v865_v21  ;;  %v867_v24 = vsub.f32 %v2767_v30, %v865_v21  ;;  %vm2267_vm4 = vcmp.eq.f32.partialorder %v2801_v46, %v865_v21  ;;  %vm2268_vm5 = vcmp.eq.f32.partialorder %v2767_v30, %v865_v21 }
 0x144   :  { %vm2269_vm6 = vcmp.eq.f32.partialorder %v2907_v59, %v865_v21  ;;  %vm2270_vm7 = vcmp.eq.f32.partialorder %v4032_v11, %v865_v21  ;;  %v2271_v13 = vsel %vm2267_vm4, %v2263_v5, 500  ;;  %v2272_v20 = vsel %vm2268_vm5, %v2264_v54, 500 }
 0x145   :  { %v870_v56 = vmul.f32 1.442695, %v866_v6  ;;  %v872_v9 = vmul.f32 1.442695, %v867_v24  ;;  %v2273_v0 = vsel %vm2269_vm6, %v2265_v37, 500  ;;  %v2274_v45 = vsel %vm2270_vm7, %v2266_v3, 500 }
 0x146   :  { %v2275_v40 = vsel %vm855_vm2, %v2271_v13, 2147483647  ;;  %v2276_v25 = vsel %vm855_vm2, %v2272_v20, 2147483647  ;;  %v2277_v8 = vsel %vm855_vm2, %v2273_v0, 2147483647  ;;  %v868_v46 = vsub.f32 %v2907_v59, %v865_v21 }
 0x147   :  { %2334 = vpow2.f32 %v870_v56  ;;  %v2278_v30 = vsel %vm859_vm3, %v2274_v45, 2147483647  ;;  %vm2279_vm8 = vcmp.lt.s32.totalorder %v2275_v40, %v2276_v25  ;;  %v869_v22 = vsub.f32 %v4032_v11, %v865_v21 }
 0x148   :  { %v2280_v5 = vsel %vm2279_vm8, %v2275_v40, %v2276_v25  ;;  %vm2281_vm9 = vcmp.lt.s32.totalorder %v2277_v8, %v2278_v30  ;;  %2336 = vpow2.f32 %v872_v9  ;;  %v874_v54 = vmul.f32 1.442695, %v868_v46 }
 0x149   :  { %v2282_v37 = vsel %vm2281_vm9, %v2277_v8, %v2278_v30  ;;  %v876_v3 = vmul.f32 1.442695, %v869_v22 }
 0x14a   :  { %vm2283_vm10 = vcmp.lt.s32.totalorder %v2280_v5, %v2282_v37  ;;  %2338 = vpow2.f32 %v874_v54 }
 0x14b   :  { %v3250_v6 = vsel %vm2283_vm10, %v2280_v5, %v2282_v37  ;;  %2340 = vpow2.f32 %v876_v3  ;;  %v4035_v5 = vld [vmem:[#allocation8_spill] sm:$0xff] }
 0x14c   :  { %4033 = vst [vmem:[#allocation9_spill] sm:$0xff] %v3250_v6  ;;  %v2286_v24 = vshra.s32 %v3250_v6, 16  ;;  %v4036_v54 = vand.u32 4294901760, %v4035_v5 }
 0x14d   :  { %v2335_v59 = vpop.eup %2334 }
 0x14e   :  { %v2337_v13 = vpop.eup %2336  ;;  %v3253_v20 = vcvt.s32.f32 %v2286_v24  ;;  %v926_v56 = vand.u32 4294901760, %v2335_v59  ;;  %v878_v21 = vsel %vm855_vm2, %v2335_v59, 0.0 }
 0x14f   :  { %v879_v11 = vsel %vm855_vm2, %v2337_v13, 0.0  ;;  %v3257_v9 = vand.u32 4294901760, %v2337_v13 }
 0x150   :  { %4034 = vst [vmem:[#allocation10_spill] sm:$0xff] %v3253_v20  ;;  %v3259_v0 = vpop.eup %2338  ;;  %2289 = vmin.xlane.f32.xlu0 %v3253_v20  ;;  %1032 = vmatmul.f32.vlgmr.msra.gmra.mxu1 %v926_v56  ;;  %v927_v22 = vsub.f32 %v2335_v59, %v926_v56  ;;  %v880_v45 = vadd.f32 %v879_v11, %v878_v21 }
 0x151   :  { %v3262_v40 = vpop.eup %2340  ;;  %1432 = vmatpush.msra.mxu1 %v2934_v44  ;;  %v881_v25 = vsel %vm855_vm2, %v3259_v0, 0.0  ;;  %v3268_v8 = vsub.f32 %v2337_v13, %v3257_v9  ;;  %v4037_v13 = vand.u32 4294901760, %v2965_v38 }
 0x152   :  { %1086 = vmatmul.f32.vlgmr.msra.gmra.mxu2 %v927_v22  ;;  %v928_v46 = vand.u32 4294901760, %v927_v22  ;;  %v882_v30 = vadd.f32 %v881_v25, %v880_v45  ;;  %v883_v37 = vsel %vm859_vm3, %v3262_v40, 0.0  ;;  %v4038_v45 = vand.u32 4294901760, %v2968_v63 }
 0x153   :  { %1434 = vmatpush.msra.mxu1 %v2936_v60  ;;  %1473 = vmatpush.msra.mxu2 %v4036_v54  ;;  %v1269_v3 = vand.u32 4294901760, %v3268_v8 }
 0x154   :  { %1125 = vmatmul.f32.vlgmr.msra.gmra.mxu3 %v928_v46  ;;  %v884_v24 = vadd.f32 %v883_v37, %v882_v30  ;;  %v929_v59 = vsub.f32 %v927_v22, %v928_v46 }
 0x155   :  { %1436 = vmatpush.msra.mxu1 %v2947_v43  ;;  %1477 = vmatpush.msra.mxu2 %v4037_v13  ;;  %v1270_v21 = vsub.f32 %v3268_v8, %v1269_v3 }
 0x156   :  { %1540 = vmatpush.msra.mxu3 %v2934_v44  ;;  %885 = vadd.xlane.f32.xlu1 %v884_v24  ;;  %v930_v11 = vand.u32 4294901760, %v929_v59  ;;  %v81_v44 = vld [vmem:[%s3960_s1 + $0x178] sm:$0xff] }
 0x157   :  { %1438 = vmatpush.msra.mxu1 %v2959_v41  ;;  %1481 = vmatpush.msra.mxu2 %v4038_v45  ;;  %v1271_v22 = vand.u32 4294901760, %v1270_v21 }
 0x158   :  { %1542 = vmatpush.msra.mxu3 %v2936_v60  ;;  %931 = vmatmul.f32.vlgmr.msra.gmra.mxu0 %v930_v11  ;;  %v79_v60 = vld [vmem:[%s3960_s1 + $0x168] sm:$0xff]  ;;  %v69_v11 = vld [vmem:[%s3960_s1 + $0x118] sm:$0xff] }
 0x159   :  { %1231 = vmatmul.f32.vlgmr.msrb.gmra.mxu1 %v926_v56  ;;  %1379 = vmatpush.msra.mxu0 %v4035_v5  ;;  %v4039_v5 = vand.u32 4294901760, %v3229_v10 }
 0x15a   :  { %1440 = vmatpush.msra.mxu1 %v2980_v29  ;;  %1485 = vmatpush.msra.mxu2 %v1296_v47  ;;  %v80_v47 = vld [vmem:[%s3960_s1 + $0x170] sm:$0xff] }
 0x15b   :  { %1544 = vmatpush.msra.mxu3 %v2947_v43  ;;  %1272 = vmatmul.f32.vlgmr.msrb.gmra.mxu2 %v1271_v22  ;;  %v3319_v43 = vand.u32 4294901760, %v80_v47 }
 0x15c   :  { %1382 = vmatpush.msra.mxu0 %v2965_v38  ;;  %1442 = vmatpush.msra.mxu1 %v3001_v28  ;;  %v77_v38 = vld [vmem:[%s3960_s1 + $0x158] sm:$0xff] }
 0x15d   :  { %1489 = vmatpush.msra.mxu2 %v1302_v33  ;;  %1546 = vmatpush.msra.mxu3 %v2959_v41  ;;  %v3310_v41 = vand.u32 4294901760, %v81_v44  ;;  %v3356_v33 = vand.u32 4294901760, %v77_v38 }
 0x15e   :  { %1373 = vmatmul.f32.vlgmr.msrb.gmra.mxu3 %v3257_v9  ;;  %1385 = vmatpush.msra.mxu0 %v2968_v63  ;;  %v3343_v63 = vsub.f32 %v80_v47, %v3319_v43 }
 0x15f   :  { %1444 = vmatpush.msra.mxu1 %v3018_v16  ;;  %1493 = vmatpush.msra.mxu2 %v1308_v62  ;;  %v76_v62 = vld [vmem:[%s3960_s1 + $0x150] sm:$0xff] }
 0x160   :  { %1548 = vmatpush.msra.mxu3 %v2980_v29  ;;  %1388 = vmatpush.msra.mxu0 %v2999_v42  ;;  %v78_v29 = vld [vmem:[%s3960_s1 + $0x160] sm:$0xff]  ;;  %v3330_v42 = vsub.f32 %v81_v44, %v3310_v41 }
 0x161   :  { %1446 = vmatpush.msra.mxu1 %v3090_v4  ;;  %1497 = vmatpush.msra.mxu2 %v1314_v15  ;;  %v3999_v15 = vand.u32 4294901760, %v3343_v63 }
 0x162   :  { %1550 = vmatpush.msra.mxu3 %v3001_v28  ;;  %1194 = vmatmul.f32.vlgmr.msrb.gmra.mxu0 %v926_v56  ;;  %v3332_v28 = vand.u32 4294901760, %v79_v60 }
 0x163   :  { %1391 = vmatpush.msra.mxu0 %v3016_v27  ;;  %1448 = vmatpush.msra.mxu1 %v3130_v57  ;;  %v3345_v27 = vand.u32 4294901760, %v78_v29 }
 0x164   :  { %1501 = vmatpush.msra.mxu2 %v1320_v1  ;;  %1552 = vmatpush.msra.mxu3 %v3018_v16  ;;  %v4000_v16 = vand.u32 4294901760, %v3330_v42 }
 0x165   :  { %1394 = vmatpush.msra.mxu0 %v3034_v50  ;;  %1450 = vmatpush.msra.mxu1 %v3140_v2  ;;  %v3354_v50 = vsub.f32 %v79_v60, %v3332_v28 }
 0x166   :  { %1505 = vmatpush.msra.mxu2 %v1326_v32  ;;  %1554 = vmatpush.msra.mxu3 %v3090_v4  ;;  %v3371_v4 = vsub.f32 %v78_v29, %v3345_v27  ;;  %v1620_v1 = vsub.f32 %v3330_v42, %v4000_v16 }
 0x167   :  { %1397 = vmatpush.msra.mxu0 %v3046_v39  ;;  %1452 = vmatpush.msra.mxu1 %v3153_v48  ;;  %v75_v39 = vld [vmem:[%s3960_s1 + $0x148] sm:$0xff] }
 0x168   :  { %1509 = vmatpush.msra.mxu2 %v1332_v14  ;;  %1556 = vmatpush.msra.mxu3 %v3130_v57  ;;  %v3375_v57 = vand.u32 4294901760, %v76_v62  ;;  %v3390_v32 = vand.u32 4294901760, %v75_v39  ;;  %v3996_v14 = vand.u32 4294901760, %v3371_v4 }
 0x169   :  { %1400 = vmatpush.msra.mxu0 %v3133_v61  ;;  %1454 = vmatpush.msra.mxu1 %v3166_v23  ;;  %v74_v61 = vld [vmem:[%s3960_s1 + $0x140] sm:$0xff] }
 0x16a   :  { %1513 = vmatpush.msra.mxu2 %v1338_v51  ;;  %1558 = vmatpush.msra.mxu3 %v3140_v2  ;;  %v3997_v2 = vand.u32 4294901760, %v3354_v50  ;;  %v3401_v51 = vand.u32 4294901760, %v74_v61  ;;  %v3419_v25 = vsub.f32 %v75_v39, %v3390_v32  ;;  %v1638_v46 = vsub.f32 %v3371_v4, %v3996_v14 }
 0x16b   :  { %1403 = vmatpush.msra.mxu0 %v3143_v7  ;;  %1456 = vmatpush.msra.mxu1 %v3178_v34  ;;  %v3388_v7 = vsub.f32 %v77_v38, %v3356_v33  ;;  %v67_v38 = vld [vmem:[%s3960_s1 + $0x108] sm:$0xff] }
 0x16c   :  { %1517 = vmatpush.msra.mxu2 %v1344_v17  ;;  %1560 = vmatpush.msra.mxu3 %v3153_v48  ;;  %v1626_v48 = vsub.f32 %v3343_v63, %v3999_v15  ;;  %v73_v17 = vld [vmem:[%s3960_s1 + $0x138] sm:$0xff]  ;;  %v3435_v30 = vsub.f32 %v74_v61, %v3401_v51  ;;  %v3993_v24 = vand.u32 4294901760, %v3419_v25  ;;  %v1639_v13 = vand.u32 4294901760, %v1638_v46 }
 0x16d   :  { %1406 = vmatpush.msra.mxu0 %v3156_v58  ;;  %1458 = vmatpush.msra.mxu1 %v3189_v53  ;;  %v3409_v58 = vsub.f32 %v76_v62, %v3375_v57  ;;  %v3995_v56 = vand.u32 4294901760, %v3388_v7 }
 0x16e   :  { %1521 = vmatpush.msra.mxu2 %v1350_v19  ;;  %1562 = vmatpush.msra.mxu3 %v3166_v23  ;;  %v1621_v23 = vand.u32 4294901760, %v1620_v1  ;;  %v1632_v19 = vsub.f32 %v3354_v50, %v3997_v2  ;;  %v3991_v21 = vand.u32 4294901760, %v3435_v30  ;;  %v1656_v47 = vsub.f32 %v3419_v25, %v3993_v24 }
 0x16f   :  { %1409 = vmatpush.msra.mxu0 %v3169_v49  ;;  %1460 = vmatpush.msra.mxu1 %v3208_v26  ;;  %v72_v49 = vld [vmem:[%s3960_s1 + $0x130] sm:$0xff]  ;;  %v1644_v37 = vsub.f32 %v3388_v7, %v3995_v56 }
 0x170   :  { %1525 = vmatpush.msra.mxu2 %v1356_v35  ;;  %1564 = vmatpush.msra.mxu3 %v3178_v34  ;;  %v3426_v35 = vand.u32 4294901760, %v73_v17  ;;  %v1627_v34 = vand.u32 4294901760, %v1626_v48  ;;  %v1633_v54 = vand.u32 4294901760, %v1632_v19  ;;  %v1662_v29 = vsub.f32 %v3435_v30, %v3991_v21  ;;  %v66_v48 = vld [vmem:[%s3960_s1 + $0x100] sm:$0xff]  ;;  %v89_v21 = vld [vmem:[%s3960_s1 + $0x1b8] sm:$0xff] }
 0x171   :  { %1412 = vmatpush.msra.mxu0 %v3181_v36  ;;  %1462 = vmatpush.msra.mxu1 %v3218_v52  ;;  %v71_v36 = vld [vmem:[%s3960_s1 + $0x128] sm:$0xff]  ;;  %v1645_v44 = vand.u32 4294901760, %v1644_v37  ;;  %v1657_v1 = vand.u32 4294901760, %v1656_v47  ;;  %v3673_v14 = vand.u32 4294901760, %v89_v21 }
 0x172   :  { %1529 = vmatpush.msra.mxu2 %v1362_v31  ;;  %1566 = vmatpush.msra.mxu3 %v3189_v53  ;;  %v3994_v31 = vand.u32 4294901760, %v3409_v58  ;;  %v3444_v53 = vand.u32 4294901760, %v72_v49  ;;  %v3460_v59 = vand.u32 4294901760, %v71_v36 }
 0x173   :  { %1466 = vmatmul.f32.vlgmr.msra.gmra.mxu1 %v1269_v3  ;;  %1415 = vmatpush.msra.mxu0 %v3192_v18  ;;  %v70_v3 = vld [vmem:[%s3960_s1 + $0x120] sm:$0xff]  ;;  %v3458_v18 = vsub.f32 %v73_v17, %v3426_v35  ;;  %v3701_v20 = vsub.f32 %v89_v21, %v3673_v14 }
 0x174   :  { %1622 = vmatpush.msrb.mxu1 %v1621_v23  ;;  %1533 = vmatpush.msra.mxu2 %v4039_v5  ;;  %v3473_v45 = vsub.f32 %v72_v49, %v3444_v53  ;;  %v3475_v22 = vand.u32 4294901760, %v70_v3  ;;  %v3488_v60 = vsub.f32 %v71_v36, %v3460_v59  ;;  %v1663_v49 = vand.u32 4294901760, %v1662_v29 }
 0x175   :  { %1568 = vmatpush.msra.mxu3 %v3208_v26  ;;  %1535 = vmatmul.f32.vlgmr.msra.gmra.mxu2 %v3257_v9  ;;  %v1650_v26 = vsub.f32 %v3409_v58, %v3994_v31  ;;  %v3532_v36 = vand.u32 4294901760, %v66_v48  ;;  %v88_v31 = vld [vmem:[%s3960_s1 + $0x1b0] sm:$0xff] }
 0x176   :  { %1628 = vmatpush.msrb.mxu1 %v1627_v34  ;;  %1720 = vmatpush.msrb.mxu2 %v3330_v42  ;;  %v3989_v39 = vand.u32 4294901760, %v3473_v45  ;;  %v3503_v61 = vsub.f32 %v70_v3, %v3475_v22  ;;  %v3988_v23 = vand.u32 4294901760, %v3488_v60  ;;  %v3688_v16 = vand.u32 4294901760, %v88_v31 }
 0x177   :  { %1418 = vmatpush.msra.mxu0 %v3211_v12  ;;  %1570 = vmatpush.msra.mxu3 %v3218_v52  ;;  %v68_v12 = vld [vmem:[%s3960_s1 + $0x110] sm:$0xff]  ;;  %v3990_v52 = vand.u32 4294901760, %v3458_v18  ;;  %v1651_v62 = vand.u32 4294901760, %v1650_v26  ;;  %v3555_v47 = vsub.f32 %v66_v48, %v3532_v36 }
 0x178   :  { %1572 = vmatmul.f32.vlgmr.msra.gmra.mxu3 %v3257_v9  ;;  %1634 = vmatpush.msrb.mxu1 %v1633_v54  ;;  %v3490_v9 = vand.u32 4294901760, %v69_v11  ;;  %v3987_v34 = vand.u32 4294901760, %v3503_v61  ;;  %v1680_v54 = vsub.f32 %v3488_v60, %v3988_v23 }
 0x179   :  { %1723 = vmatpush.msrb.mxu2 %v3343_v63  ;;  %1773 = vmatpush.msrb.mxu3 %v3310_v41  ;;  %v1668_v17 = vsub.f32 %v3458_v18, %v3990_v52  ;;  %v90_v52 = vld [vmem:[%s3960_s1 + $0x1c0] sm:$0xff] }
 0x17a   :  { %1421 = vmatpush.msra.mxu0 %v3221_v55  ;;  %1640 = vmatpush.msrb.mxu1 %v1639_v13  ;;  %v3505_v55 = vand.u32 4294901760, %v68_v12  ;;  %v3518_v19 = vsub.f32 %v69_v11, %v3490_v9  ;;  %v96_v13 = vld [vmem:[%s3960_s1 + $0x1f0] sm:$0xf]  ;;  %v1686_v26 = vsub.f32 %v3503_v61, %v3987_v34  ;;  %v1681_v29 = vand.u32 4294901760, %v1680_v54  ;;  %v91_v34 = vld [vmem:[%s3960_s1 + $0x1c8] sm:$0xff] }
 0x17b   :  { %1726 = vmatpush.msrb.mxu2 %v3354_v50  ;;  %1775 = vmatpush.msrb.mxu3 %v3319_v43  ;;  %v1669_v5 = vand.u32 4294901760, %v1668_v17 }
 0x17c   :  { %1424 = vmatpush.msra.mxu0 %v3229_v10  ;;  %1646 = vmatpush.msrb.mxu1 %v1645_v44  ;;  %v3520_v10 = vand.u32 4294901760, %v67_v38  ;;  %v3530_v46 = vsub.f32 %v68_v12, %v3505_v55  ;;  %v3986_v37 = vand.u32 4294901760, %v3518_v19  ;;  %v892_v12 = vsel %vm102_vm0, %v96_v13, 0 }
 0x17d   :  { %1427 = vmatmul.f32.vlgmr.msra.gmra.mxu0 %v3268_v8  ;;  %1729 = vmatpush.msrb.mxu2 %v3371_v4  ;;  %v1674_v8 = vsub.f32 %v3473_v45, %v3989_v39  ;;  %v1687_v48 = vand.u32 4294901760, %v1686_v26 }
 0x17e   :  { %1577 = vmatpush.msrb.mxu0 %v3310_v41  ;;  %1777 = vmatpush.msrb.mxu3 %v3332_v28  ;;  %v3542_v3 = vsub.f32 %v67_v38, %v3520_v10  ;;  %v3984_v44 = vand.u32 4294901760, %v3530_v46  ;;  %v1692_v38 = vsub.f32 %v3518_v19, %v3986_v37 }
 0x17f   :  { %1652 = vmatpush.msrb.mxu1 %v1651_v62  ;;  %1732 = vmatpush.msrb.mxu2 %v3388_v7  ;;  %v1675_v11 = vand.u32 4294901760, %v1674_v8  ;;  %v3575_v8 = vand.u32 4294901760, %v892_v12 }
 0x180   :  { %1579 = vmatpush.msrb.mxu0 %v3319_v43  ;;  %1779 = vmatpush.msrb.mxu3 %v3345_v27  ;;  %v3983_v62 = vand.u32 4294901760, %v3542_v3  ;;  %v1698_v17 = vsub.f32 %v3530_v46, %v3984_v44 }
 0x181   :  { %1658 = vmatpush.msrb.mxu1 %v1657_v1  ;;  %1735 = vmatpush.msrb.mxu2 %v3409_v58  ;;  %v95_v1 = vld [vmem:[%s3960_s1 + $0x1e8] sm:$0xff] }
 0x182   :  { %1581 = vmatpush.msrb.mxu0 %v3332_v28  ;;  %1781 = vmatpush.msrb.mxu3 %v3356_v33  ;;  %v1704_v54 = vsub.f32 %v3542_v3, %v3983_v62  ;;  %v3583_v13 = vand.u32 4294901760, %v95_v1  ;;  %v1699_v26 = vand.u32 4294901760, %v1698_v17  ;;  %v93_v62 = vld [vmem:[%s3960_s1 + $0x1d8] sm:$0xff] }
 0x183   :  { %1664 = vmatpush.msrb.mxu1 %v1663_v49  ;;  %1738 = vmatpush.msrb.mxu2 %v3419_v25  ;;  %v3985_v49 = vand.u32 4294901760, %v3555_v47  ;;  %v3616_v37 = vand.u32 4294901760, %v93_v62 }
 0x184   :  { %1583 = vmatpush.msrb.mxu0 %v3345_v27  ;;  %1783 = vmatpush.msrb.mxu3 %v3375_v57  ;;  %v1705_v17 = vand.u32 4294901760, %v1704_v54 }
 0x185   :  { %1670 = vmatpush.msrb.mxu1 %v1669_v5  ;;  %1741 = vmatpush.msrb.mxu2 %v3435_v30  ;;  %v1693_v5 = vand.u32 4294901760, %v1692_v38  ;;  %v3595_v38 = vsub.f32 %v892_v12, %v3575_v8  ;;  %v3609_v12 = vand.u32 4294901760, %v3259_v0 }
 0x186   :  { %1585 = vmatpush.msrb.mxu0 %v3356_v33  ;;  %1785 = vmatpush.msrb.mxu3 %v3390_v32 }
 0x187   :  { %1676 = vmatpush.msrb.mxu1 %v1675_v11  ;;  %1744 = vmatpush.msrb.mxu2 %v3458_v18  ;;  %v94_v11 = vld [vmem:[%s3960_s1 + $0x1e0] sm:$0xff]  ;;  %v3992_v54 = vand.u32 4294901760, %v3595_v38 }
 0x188   :  { %1587 = vmatpush.msrb.mxu0 %v3375_v57  ;;  %1787 = vmatpush.msrb.mxu3 %v3401_v51  ;;  %v3602_v44 = vand.u32 4294901760, %v94_v11 }
 0x189   :  { %1682 = vmatpush.msrb.mxu1 %v1681_v29  ;;  %1747 = vmatpush.msrb.mxu2 %v3473_v45  ;;  %v1710_v29 = vsub.f32 %v3555_v47, %v3985_v49  ;;  %v3612_v49 = vsub.f32 %v95_v1, %v3583_v13 }
 0x18a   :  { %1589 = vmatpush.msrb.mxu0 %v3390_v32  ;;  %1789 = vmatpush.msrb.mxu3 %v3426_v35  ;;  %v3628_v1 = vsub.f32 %v94_v11, %v3602_v44  ;;  %v3642_v11 = vsub.f32 %v93_v62, %v3616_v37 }
 0x18b   :  { %1688 = vmatpush.msrb.mxu1 %v1687_v48  ;;  %1750 = vmatpush.msrb.mxu2 %v3488_v60  ;;  %v92_v48 = vld [vmem:[%s3960_s1 + $0x1d0] sm:$0xff]  ;;  %v3998_v39 = vand.u32 4294901760, %v3612_v49 }
 0x18c   :  { %1591 = vmatpush.msrb.mxu0 %v3401_v51  ;;  %1791 = vmatpush.msrb.mxu3 %v3444_v53  ;;  %v3623_v23 = vand.u32 4294901760, %v92_v48  ;;  %v4001_v62 = vand.u32 4294901760, %v3628_v1 }
 0x18d   :  { %1694 = vmatpush.msrb.mxu1 %v1693_v5  ;;  %1753 = vmatpush.msrb.mxu2 %v3503_v61  ;;  %v1711_v5 = vand.u32 4294901760, %v1710_v29  ;;  %v3634_v29 = vand.u32 4294901760, %v91_v34 }
 0x18e   :  { %1593 = vmatpush.msrb.mxu0 %v3426_v35  ;;  %1793 = vmatpush.msrb.mxu3 %v3460_v59 }
 0x18f   :  { %1700 = vmatpush.msrb.mxu1 %v1699_v26  ;;  %1756 = vmatpush.msrb.mxu2 %v3518_v19  ;;  %v1609_v26 = vsub.f32 %v3259_v0, %v3609_v12  ;;  %v1961_v0 = vsub.f32 %v3595_v38, %v3992_v54  ;;  %v3665_v24 = vsub.f32 %v91_v34, %v3634_v29  ;;  %v87_v34 = vld [vmem:[%s3960_s1 + $0x1a8] sm:$0xff] }
 0x190   :  { %1595 = vmatpush.msrb.mxu0 %v3444_v53  ;;  %1795 = vmatpush.msrb.mxu3 %v3475_v22  ;;  %v3703_v6 = vand.u32 4294901760, %v87_v34 }
 0x191   :  { %1706 = vmatpush.msrb.mxu1 %v1705_v17  ;;  %1759 = vmatpush.msrb.mxu2 %v3530_v46  ;;  %v3649_v17 = vsub.f32 %v92_v48, %v3623_v23  ;;  %v1610_v54 = vand.u32 4294901760, %v1609_v26  ;;  %v1967_v48 = vsub.f32 %v3612_v49, %v3998_v39  ;;  %4041 = vst [vmem:[#allocation11_spill] sm:$0xff] %v3665_v24  ;;  %v1962_v2 = vand.u32 4294901760, %v1961_v0 }
 0x192   :  { %1597 = vmatpush.msrb.mxu0 %v3460_v59  ;;  %1797 = vmatpush.msrb.mxu3 %v3490_v9  ;;  %v3731_v21 = vsub.f32 %v87_v34, %v3703_v6 }
 0x193   :  { %1712 = vmatpush.msrb.mxu1 %v1711_v5  ;;  %1762 = vmatpush.msrb.mxu2 %v3542_v3  ;;  %4040 = vst [vmem:[#allocation8_spill] sm:$0xff] %v3649_v17  ;;  %v3657_v5 = vand.u32 4294901760, %v90_v52  ;;  %v1968_v0 = vand.u32 4294901760, %v1967_v48  ;;  %v1611_v39 = vsub.f32 %v1609_v26, %v1610_v54 }
 0x194   :  { %1599 = vmatpush.msrb.mxu0 %v3475_v22  ;;  %1799 = vmatpush.msrb.mxu3 %v3505_v55 }
 0x195   :  { %1714 = vmatmul.f32.vlgmr.msrb.gmra.mxu1 %v3609_v12  ;;  %1765 = vmatpush.msrb.mxu2 %v3555_v47  ;;  %v3686_v15 = vsub.f32 %v90_v52, %v3657_v5  ;;  %v4042_v52 = vand.u32 4294901760, %v3642_v11 }
 0x196   :  { %1881 = vmatpush.msra.mxu1 %v3310_v41  ;;  %1601 = vmatpush.msrb.mxu0 %v3490_v9  ;;  %v1973_v41 = vsub.f32 %v3628_v1, %v4001_v62 }
 0x197   :  { %1801 = vmatpush.msrb.mxu3 %v3520_v10  ;;  %1768 = vmatmul.f32.vlgmr.msrb.gmra.mxu2 %v1609_v26  ;;  %v1979_v62 = vsub.f32 %v3642_v11, %v4042_v52  ;;  %v4043_v26 = vand.u32 4294901760, %v3649_v17  ;;  %v3716_v52 = vsub.f32 %v88_v31, %v3688_v16 }
 0x198   :  { %1883 = vmatpush.msra.mxu1 %v3319_v43  ;;  %1919 = vmatpush.msra.mxu2 %v3575_v8  ;;  %v86_v43 = vld [vmem:[%s3960_s1 + $0x1a0] sm:$0xff] }
 0x199   :  { %1603 = vmatpush.msrb.mxu0 %v3505_v55  ;;  %1803 = vmatpush.msrb.mxu3 %v3532_v36  ;;  %v1985_v48 = vsub.f32 %v3649_v17, %v4043_v26  ;;  %v3718_v56 = vand.u32 4294901760, %v86_v43  ;;  %v4044_v26 = vand.u32 4294901760, %v3665_v24  ;;  %v1980_v31 = vand.u32 4294901760, %v1979_v62 }
 0x19a   :  { %1807 = vmatmul.f32.vlgmr.msrb.gmra.mxu3 %v1610_v54  ;;  %1885 = vmatpush.msra.mxu1 %v3332_v28  ;;  %v85_v28 = vld [vmem:[%s3960_s1 + $0x198] sm:$0xff]  ;;  %v1974_v54 = vand.u32 4294901760, %v1973_v41 }
 0x19b   :  { %1921 = vmatpush.msra.mxu2 %v3583_v13  ;;  %1963 = vmatpush.msra.mxu3 %v1962_v2  ;;  %v1612_v2 = vand.u32 4294901760, %v1611_v39  ;;  %v1991_v17 = vsub.f32 %v3665_v24, %v4044_v26  ;;  %v3733_v39 = vand.u32 4294901760, %v85_v28  ;;  %v83_v26 = vld [vmem:[%s3960_s1 + $0x188] sm:$0xff]  ;;  %v4045_v24 = vand.u32 4294901760, %v3330_v42 }
 0x19c   :  { %1605 = vmatpush.msrb.mxu0 %v3520_v10  ;;  %1887 = vmatpush.msra.mxu1 %v3345_v27  ;;  %v84_v27 = vld [vmem:[%s3960_s1 + $0x190] sm:$0xff]  ;;  %v3746_v41 = vsub.f32 %v86_v43, %v3718_v56  ;;  %v889_v42 = vsel %vm887_vm11, %v3262_v40, 0  ;;  %v4049_v40 = vand.u32 4294901760, %v3354_v50  ;;  %v4051_v50 = vand.u32 4294901760, %v3371_v4 }
 0x19d   :  { %1923 = vmatpush.msra.mxu2 %v3602_v44  ;;  %1969 = vmatpush.msra.mxu3 %v1968_v0  ;;  %v1986_v0 = vand.u32 4294901760, %v1985_v48  ;;  %v1992_v48 = vand.u32 4294901760, %v1991_v17  ;;  %v3761_v34 = vsub.f32 %v85_v28, %v3733_v39  ;;  %v82_v17 = vld [vmem:[%s3960_s1 + $0x180] sm:$0xff]  ;;  %v3783_v43 = vand.u32 4294901760, %v889_v42  ;;  %s2396_s1 = smov [#allocation4]  }
 0x19e   :  { %1607 = vmatpush.msrb.mxu0 %v3532_v36  ;;  %1889 = vmatpush.msra.mxu1 %v3356_v33  ;;  %v4046_v33 = vand.u32 4294901760, %v3686_v15  ;;  %s2316_s8 = sshll.u32 %s2396_s1, 4  ;;  %s2317_s8 = int_to_ptr.vmem [resolvable:$true] %s2316_s8 }
 0x19f   :  { %1613 = vmatmul.f32.vlgmr.msrb.gmra.mxu0 %v1612_v2  ;;  %1925 = vmatpush.msra.mxu2 %v3616_v37  ;;  %v3748_v2 = vand.u32 4294901760, %v84_v27 }
 0x1a0   :  { %1814 = vmatpush.msra.mxu0 %v4045_v24  ;;  %1975 = vmatpush.msra.mxu3 %v1974_v54  ;;  %v1997_v62 = vsub.f32 %v3686_v15, %v4046_v33  ;;  %v4047_v24 = vand.u32 4294901760, %v3343_v63  ;;  %v4048_v54 = vand.u32 4294901760, %v3701_v20 }
 0x1a1   :  { %1891 = vmatpush.msra.mxu1 %v3375_v57  ;;  %1927 = vmatpush.msra.mxu2 %v3623_v23  ;;  %v3763_v57 = vand.u32 4294901760, %v83_v26 }
 0x1a2   :  { %1818 = vmatpush.msra.mxu0 %v4047_v24  ;;  %1981 = vmatpush.msra.mxu3 %v1980_v31  ;;  %v2003_v33 = vsub.f32 %v3701_v20, %v4048_v54  ;;  %v1998_v63 = vand.u32 4294901760, %v1997_v62  ;;  %v4050_v31 = vand.u32 4294901760, %v3716_v52  ;;  %v2020_v24 = vand.u32 4294901760, %v3746_v41 }
 0x1a3   :  { %1893 = vmatpush.msra.mxu1 %v3390_v32  ;;  %1929 = vmatpush.msra.mxu2 %v3634_v29  ;;  %v3777_v54 = vsub.f32 %v84_v27, %v3748_v2  ;;  %v3781_v32 = vand.u32 4294901760, %v82_v17  ;;  %v4052_v62 = vand.u32 4294901760, %v3731_v21  ;;  %v2026_v27 = vand.u32 4294901760, %v3761_v34 }
 0x1a4   :  { %1822 = vmatpush.msra.mxu0 %v4049_v40  ;;  %1987 = vmatpush.msra.mxu3 %v1986_v0  ;;  %v2009_v28 = vsub.f32 %v3716_v52, %v4050_v31  ;;  %v2004_v0 = vand.u32 4294901760, %v2003_v33  ;;  %v3792_v31 = vsub.f32 %v83_v26, %v3763_v57  ;;  %v3805_v26 = vsub.f32 %v889_v42, %v3783_v43 }
 0x1a5   :  { %1895 = vmatpush.msra.mxu1 %v3401_v51  ;;  %1931 = vmatpush.msra.mxu2 %v3657_v5  ;;  %v2015_v40 = vsub.f32 %v3731_v21, %v4052_v62  ;;  %v4053_v51 = vand.u32 4294901760, %v3388_v7  ;;  %v2032_v33 = vand.u32 4294901760, %v3777_v54  ;;  %v4054_v7 = vand.u32 4294901760, %v3409_v58 }
 0x1a6   :  { %1826 = vmatpush.msra.mxu0 %v4051_v50  ;;  %1993 = vmatpush.msra.mxu3 %v1992_v48  ;;  %v2010_v4 = vand.u32 4294901760, %v2009_v28  ;;  %v2021_v48 = vsub.f32 %v3746_v41, %v2020_v24  ;;  %v2027_v28 = vsub.f32 %v3761_v34, %v2026_v27  ;;  %v2038_v50 = vand.u32 4294901760, %v3792_v31 }
 0x1a7   :  { %1897 = vmatpush.msra.mxu1 %v3426_v35  ;;  %1933 = vmatpush.msra.mxu2 %v3673_v14  ;;  %v3808_v35 = vsub.f32 %v82_v17, %v3781_v32  ;;  %v2033_v58 = vsub.f32 %v3777_v54, %v2032_v33  ;;  %v1950_v17 = vand.u32 4294901760, %v3805_v26 }
 0x1a8   :  { %1830 = vmatpush.msra.mxu0 %v4053_v51  ;;  %1999 = vmatpush.msra.mxu3 %v1998_v63  ;;  %v2016_v63 = vand.u32 4294901760, %v2015_v40  ;;  %v2022_v42 = vand.u32 4294901760, %v2021_v48  ;;  %v2039_v62 = vsub.f32 %v3792_v31, %v2038_v50 }
 0x1a9   :  { %1899 = vmatpush.msra.mxu1 %v3444_v53  ;;  %1935 = vmatpush.msra.mxu2 %v3688_v16  ;;  %v4055_v53 = vand.u32 4294901760, %v3419_v25  ;;  %v2028_v25 = vand.u32 4294901760, %v2027_v28  ;;  %v2034_v40 = vand.u32 4294901760, %v2033_v58 }
 0x1aa   :  { %1834 = vmatpush.msra.mxu0 %v4054_v7  ;;  %2005 = vmatpush.msra.mxu3 %v2004_v0  ;;  %v2044_v0 = vand.u32 4294901760, %v3808_v35  ;;  %v4060_v7 = vand.u32 4294901760, %v3503_v61  ;;  %v4063_v61 = vand.u32 4294901760, %v3542_v3  ;;  %v4068_v3 = vand.u32 4294901760, %v3612_v49 }
 0x1ab   :  { %1901 = vmatpush.msra.mxu1 %v3460_v59  ;;  %1937 = vmatpush.msra.mxu2 %v3703_v6  ;;  %v4056_v59 = vand.u32 4294901760, %v3435_v30  ;;  %v1951_v30 = vsub.f32 %v3805_v26, %v1950_v17 }
 0x1ac   :  { %1838 = vmatpush.msra.mxu0 %v4055_v53  ;;  %2011 = vmatpush.msra.mxu3 %v2010_v4  ;;  %v2045_v51 = vsub.f32 %v3808_v35, %v2044_v0 }
 0x1ad   :  { %1903 = vmatpush.msra.mxu1 %v3475_v22  ;;  %1939 = vmatpush.msra.mxu2 %v3718_v56  ;;  %v4057_v22 = vand.u32 4294901760, %v3458_v18  ;;  %v2040_v18 = vand.u32 4294901760, %v2039_v62  ;;  %v1952_v4 = vand.u32 4294901760, %v1951_v30 }
 0x1ae   :  { %1842 = vmatpush.msra.mxu0 %v4056_v59  ;;  %2017 = vmatpush.msra.mxu3 %v2016_v63  ;;  %v2046_v48 = vand.u32 4294901760, %v2045_v51 }
 0x1af   :  { %1905 = vmatpush.msra.mxu1 %v3490_v9  ;;  %1941 = vmatpush.msra.mxu2 %v3733_v39  ;;  %v4058_v9 = vand.u32 4294901760, %v3473_v45  ;;  %v4061_v45 = vand.u32 4294901760, %v3518_v19  ;;  %v4064_v19 = vand.u32 4294901760, %v3555_v47  ;;  %v4071_v47 = vld [vmem:[#allocation9_spill] sm:$0xff] }
 0x1b0   :  { %1846 = vmatpush.msra.mxu0 %v4057_v22  ;;  %2023 = vmatpush.msra.mxu3 %v2022_v42 }
 0x1b1   :  { %1907 = vmatpush.msra.mxu1 %v3505_v55  ;;  %1943 = vmatpush.msra.mxu2 %v3748_v2  ;;  %v4059_v55 = vand.u32 4294901760, %v3488_v60  ;;  %v4062_v60 = vand.u32 4294901760, %v3530_v46  ;;  %v4066_v46 = vand.u32 4294901760, %v3595_v38 }
 0x1b2   :  { %1850 = vmatpush.msra.mxu0 %v4058_v9  ;;  %2029 = vmatpush.msra.mxu3 %v2028_v25 }
 0x1b3   :  { %1909 = vmatpush.msra.mxu1 %v3520_v10  ;;  %1945 = vmatpush.msra.mxu2 %v3763_v57  ;;  %v4065_v10 = vld [vmem:[#allocation8_spill] sm:$0xff] }
 0x1b4   :  { %1854 = vmatpush.msra.mxu0 %v4059_v55  ;;  %2035 = vmatpush.msra.mxu3 %v2034_v40 }
 0x1b5   :  { %1911 = vmatpush.msra.mxu1 %v3532_v36  ;;  %1947 = vmatpush.msra.mxu2 %v3781_v32  ;;  %v4067_v36 = vld [vmem:[#allocation11_spill] sm:$0xff] }
 0x1b6   :  { %1858 = vmatpush.msra.mxu0 %v4060_v7  ;;  %2041 = vmatpush.msra.mxu3 %v2040_v18 }
 0x1b7   :  { %1913 = vmatmul.f32.vlgmr.msra.gmra.mxu1 %v3609_v12  ;;  %1953 = vmatmul.f32.vlgmr.msra.gmra.mxu2 %v1952_v4 }
 0x1b8   :  { %2056 = vmatpush.msrb.mxu2 %v3595_v38  ;;  %2211 = vmatpush.msrb.mxu1 %v3575_v8  ;;  %v4074_v38 = vand.u32 4294901760, %v4067_v36 }
 0x1b9   :  { %1862 = vmatpush.msra.mxu0 %v4061_v45  ;;  %2047 = vmatpush.msra.mxu3 %v2046_v48 }
 0x1ba   :  { %2049 = vmatmul.f32.vlgmr.msra.gmra.mxu3 %v3783_v43  ;;  %2059 = vmatpush.msrb.mxu2 %v3612_v49  ;;  %v2285_v49 = vand.u32 65535, %v4071_v47 }
 0x1bb   :  { %2107 = vmatpush.msrb.mxu3 %v3575_v8  ;;  %2213 = vmatpush.msrb.mxu1 %v3583_v13  ;;  %v4072_v8 = vand.u32 4294901760, %v4065_v10 }
 0x1bc   :  { %1866 = vmatpush.msra.mxu0 %v4062_v60  ;;  %2062 = vmatpush.msrb.mxu2 %v3628_v1 }
 0x1bd   :  { %2109 = vmatpush.msrb.mxu3 %v3583_v13  ;;  %2215 = vmatpush.msrb.mxu1 %v3602_v44  ;;  %v4073_v13 = vld [vmem:[#allocation10_spill] sm:$0xff] }
 0x1be   :  { %1870 = vmatpush.msra.mxu0 %v4063_v61  ;;  %2065 = vmatpush.msrb.mxu2 %v3642_v11 }
 0x1bf   :  { %2111 = vmatpush.msrb.mxu3 %v3602_v44  ;;  %2217 = vmatpush.msrb.mxu1 %v3616_v37 }
 0x1c0   :  { %1874 = vmatpush.msra.mxu0 %v4064_v19  ;;  %2068 = vmatpush.msrb.mxu2 %v4065_v10 }
 0x1c1   :  { %1876 = vmatmul.f32.vlgmr.msra.gmra.mxu0 %v3609_v12  ;;  %2113 = vmatpush.msrb.mxu3 %v3616_v37  ;;  %v4069_v37 = vand.u32 4294901760, %v3628_v1  ;;  %v2287_v12 = vcvt.s32.f32 %v2285_v49 }
 0x1c2   :  { %2147 = vmatpush.msrb.mxu0 %v4066_v46  ;;  %2219 = vmatpush.msrb.mxu1 %v3623_v23 }
 0x1c3   :  { %2071 = vmatpush.msrb.mxu2 %v4067_v36  ;;  %2115 = vmatpush.msrb.mxu3 %v3623_v23  ;;  %v4070_v23 = vand.u32 4294901760, %v3642_v11  ;;  %v3896_v44 = vpop.xlane.xlu0 %2289 }
 0x1c4   :  { %2151 = vmatpush.msrb.mxu0 %v4068_v3  ;;  %2221 = vmatpush.msrb.mxu1 %v3634_v29  ;;  %vm2291_vm12 = vcmp.eq.f32.partialorder %v4073_v13, %v3896_v44  ;;  %v2296_v58 = vcvt.f32.s32 %v3896_v44 }
 0x1c5   :  { %2074 = vmatpush.msrb.mxu2 %v3686_v15  ;;  %2117 = vmatpush.msrb.mxu3 %v3634_v29  ;;  %v2292_v1 = vsel %vm2291_vm12, %v2287_v12, inf }
 0x1c6   :  { %2155 = vmatpush.msrb.mxu0 %v4069_v37  ;;  %2223 = vmatpush.msrb.mxu1 %v3657_v5  ;;  %v2297_v25 = vshll.u32 %v2296_v58, 16 }
 0x1c7   :  { %2077 = vmatpush.msrb.mxu2 %v3701_v20  ;;  %2119 = vmatpush.msrb.mxu3 %v3657_v5 }
 0x1c8   :  { %2159 = vmatpush.msrb.mxu0 %v4070_v23  ;;  %2225 = vmatpush.msrb.mxu1 %v3673_v14 }
 0x1c9   :  { %2080 = vmatpush.msrb.mxu2 %v3716_v52  ;;  %2121 = vmatpush.msrb.mxu3 %v3673_v14  ;;  %v4075_v14 = vand.u32 4294901760, %v3686_v15  ;;  %v4078_v15 = vand.u32 4294901760, %v3731_v21  ;;  %v886_v63 = vpop.xlane.xlu1 %885 }
 0x1ca   :  { %2163 = vmatpush.msrb.mxu0 %v4072_v8  ;;  %2227 = vmatpush.msrb.mxu1 %v3688_v16  ;;  %2342 = vrcp.f32 %v886_v63  ;;  %v2256_v44 = vand.u32 2147483648, %v886_v63  ;;  %vm2250_vm15 = vweird.f32 %v886_v63  ;;  %v2254_v8 = vand.u32 2147483647, %v886_v63 }
 0x1cb   :  { %2083 = vmatpush.msrb.mxu2 %v3731_v21  ;;  %2123 = vmatpush.msrb.mxu3 %v3688_v16  ;;  %v4076_v16 = vand.u32 4294901760, %v3701_v20 }
 0x1cc   :  { %2167 = vmatpush.msrb.mxu0 %v4074_v38  ;;  %2229 = vmatpush.msrb.mxu1 %v3703_v6  ;;  %vm2255_vm1 = vcmp.eq.f32.partialorder %v2254_v8, 8.507059e+37 }
 0x1cd   :  { %2086 = vmatpush.msrb.mxu2 %v3746_v41  ;;  %2125 = vmatpush.msrb.mxu3 %v3703_v6  ;;  %v4077_v6 = vand.u32 4294901760, %v3716_v52 }
 0x1ce   :  { %2171 = vmatpush.msrb.mxu0 %v4075_v14  ;;  %2231 = vmatpush.msrb.mxu1 %v3718_v56  ;;  %v2257_v14 = vor.u32 1.1754944e-38, %v2256_v44 }
 0x1cf   :  { %2089 = vmatpush.msrb.mxu2 %v3761_v34  ;;  %2127 = vmatpush.msrb.mxu3 %v3718_v56  ;;  %v1033_v56 = vpop.f32.mrf.mxu1 }
 0x1d0   :  { %2175 = vmatpush.msrb.mxu0 %v4076_v16  ;;  %2233 = vmatpush.msrb.mxu1 %v3733_v39  ;;  %v2343_v55 = vpop.eup %2342 }
 0x1d1   :  { %2293 = vmin.xlane.f32.xlu1 %v2292_v1  ;;  %2092 = vmatpush.msrb.mxu2 %v3777_v54  ;;  %v2246_v48 = vmul.f32 %v2343_v55, %v886_v63  ;;  %vm2251_vm14 = vweird.f32 %v2343_v55 }
 0x1d2   :  { %2129 = vmatpush.msrb.mxu3 %v3733_v39  ;;  %2179 = vmatpush.msrb.mxu0 %v4077_v6  ;;  %vm2252_vm0 = vmor %vm2250_vm15, %vm2251_vm14 }
 0x1d3   :  { %2235 = vmatpush.msrb.mxu1 %v3748_v2  ;;  %2095 = vmatpush.msrb.mxu2 %v3792_v31  ;;  %v2247_v61 = vsub.f32 1.0, %v2246_v48 }
 0x1d4   :  { %2131 = vmatpush.msrb.mxu3 %v3748_v2  ;;  %2183 = vmatpush.msrb.mxu0 %v4078_v15 }
 0x1d5   :  { %2237 = vmatpush.msrb.mxu1 %v3763_v57  ;;  %2098 = vmatpush.msrb.mxu2 %v3808_v35  ;;  %v932_v20 = vpop.f32.mrf.mxu0  ;;  %v1087_v11 = vpop.f32.mrf.mxu2  ;;  %v2248_v46 = vmul.f32 %v2343_v55, %v2247_v61 }
 0x1d6   :  { %2133 = vmatpush.msrb.mxu3 %v3763_v57  ;;  %2187 = vmatpush.msrb.mxu0 %v2020_v24  ;;  %v1034_v29 = vadd.f32 %v1033_v56, %v932_v20 }
 0x1d7   :  { %2239 = vmatpush.msrb.mxu1 %v3781_v32  ;;  %2101 = vmatmul.f32.vlgmr.msrb.gmra.mxu2 %v3805_v26  ;;  %v1126_v21 = vpop.f32.mrf.mxu3  ;;  %v1232_v34 = vpop.f32.mrf.mxu1  ;;  %v2249_v23 = vadd.f32 %v2343_v55, %v2248_v46 }
 0x1d8   :  { %2241 = vmatmul.f32.vlgmr.msrb.gmra.mxu1 %v3783_v43  ;;  %2135 = vmatpush.msrb.mxu3 %v3781_v32  ;;  %v1088_v5 = vadd.f32 %v1087_v11, %v1034_v29 }
 0x1d9   :  { %2191 = vmatpush.msrb.mxu0 %v2026_v27  ;;  %2139 = vmatmul.f32.vlgmr.msrb.gmra.mxu3 %v1950_v17  ;;  %v2253_v12 = vsel %vm2252_vm0, %v2343_v55, %v2249_v23 }
 0x1da   :  { %v1127_v41 = vadd.f32 %v1126_v21, %v1088_v5  ;;  %v2258_v6 = vsel %vm2255_vm1, %v2257_v14, %v2253_v12 }
 0x1db   :  { %2195 = vmatpush.msrb.mxu0 %v2032_v33 }
 0x1dd   :  { %2199 = vmatpush.msrb.mxu0 %v2038_v50 }
 0x1de   :  { %v1273_v57 = vpop.f32.mrf.mxu2 }
 0x1df   :  { %2203 = vmatpush.msrb.mxu0 %v2044_v0  ;;  %v1195_v52 = vpop.f32.mrf.mxu0 }
 0x1e0   :  { %2205 = vmatmul.f32.vlgmr.msrb.gmra.mxu0 %v3783_v43  ;;  %v1196_v39 = vadd.f32 %v1195_v52, %v1127_v41 }
 0x1e1   :  { %v1374_v54 = vpop.f32.mrf.mxu3 }
 0x1e2   :  { %v1233_v2 = vadd.f32 %v1232_v34, %v1196_v39 }
 0x1e4   :  { %v1274_v24 = vadd.f32 %v1273_v57, %v1233_v2 }
 0x1e6   :  { %v1375_v27 = vadd.f32 %v1374_v54, %v1274_v24 }
 0x1f0   :  { %v1467_v33 = vpop.f32.mrf.mxu1 }
 0x1f8   :  { %v1536_v43 = vpop.f32.mrf.mxu2 }
 0x1fa   :  { %v1428_v32 = vpop.f32.mrf.mxu0 }
 0x1fb   :  { %v1429_v31 = vadd.f32 %v1428_v32, %v1375_v27  ;;  %v1573_v28 = vpop.f32.mrf.mxu3 }
 0x1fd   :  { %v1468_v26 = vadd.f32 %v1467_v33, %v1429_v31 }
 0x1ff   :  { %v1537_v35 = vadd.f32 %v1536_v43, %v1468_v26 }
 0x201   :  { %v1574_v53 = vadd.f32 %v1573_v28, %v1537_v35 }
 0x212   :  { %v1715_v17 = vpop.f32.mrf.mxu1 }
 0x21a   :  { %v1769_v22 = vpop.f32.mrf.mxu2 }
 0x21c   :  { %v1614_v50 = vpop.f32.mrf.mxu0 }
 0x21d   :  { %v1615_v42 = vadd.f32 %v1614_v50, %v1574_v53  ;;  %v1808_v51 = vpop.f32.mrf.mxu3 }
 0x21f   :  { %v1716_v0 = vadd.f32 %v1715_v17, %v1615_v42 }
 0x221   :  { %v1770_v40 = vadd.f32 %v1769_v22, %v1716_v0 }
 0x223   :  { %v1809_v18 = vadd.f32 %v1808_v51, %v1770_v40 }
 0x234   :  { %v1914_v7 = vpop.f32.mrf.mxu1 }
 0x23a   :  { %v1954_v60 = vpop.f32.mrf.mxu2 }
 0x23d   :  { %v2050_v19 = vpop.f32.mrf.mxu3 }
 0x23e   :  { %v1877_v9 = vpop.f32.mrf.mxu0 }
 0x23f   :  { %v1878_v4 = vadd.f32 %v1877_v9, %v1809_v18 }
 0x241   :  { %v1915_v45 = vadd.f32 %v1914_v7, %v1878_v4 }
 0x243   :  { %v1955_v10 = vadd.f32 %v1954_v60, %v1915_v45 }
 0x244   :  { %v2294_v59 = vpop.xlane.xlu1 %2293 }
 0x245   :  { %v2295_v62 = vcvt.f32.s32 %v2294_v59  ;;  %v2051_v36 = vadd.f32 %v2050_v19, %v1955_v10 }
 0x247   :  { %v2298_v30 = vadd.s32 %v2297_v25, %v2295_v62 }
 0x249   :  { %2299 = vst.msk [vmem:[#allocation4] sm:$0x1] %vm2260_vm13, %v2298_v30 }
 0x24a   :  { %2321 = dma.vmem_to_hbm [thread:$0]  %s2317_s8, 16, %s2319_s11, [#allocation5]  }
 0x255   :  { %v2242_v1 = vpop.f32.mrf.mxu1 }
 0x25a   :  { %v2102_v3 = vpop.f32.mrf.mxu2 }
 0x25b   :  { %v2103_v37 = vadd.f32 %v2102_v3, %v2051_v36 }
 0x25c   :  { %v2140_v47 = vpop.f32.mrf.mxu3 }
 0x25d   :  { %v2141_v49 = vadd.f32 %v2140_v47, %v2103_v37  ;;  %v2206_v13 = vpop.f32.mrf.mxu0 }
 0x25f   :  { %v2207_v38 = vadd.f32 %v2206_v13, %v2141_v49 }
 0x261   :  { %v2243_v16 = vadd.f32 %v2242_v1, %v2207_v38 }
 0x263   :  { %v2259_v15 = vmul.f32 %v2258_v6, %v2243_v16 }
 0x265   :  { %2261 = vst.msk [vmem:[#allocation2] sm:$0x1] %vm2260_vm13, %v2259_v15 }
 0x266   :  { %2310 = dma.vmem_to_hbm [thread:$0]  %s2306_s12, 16, %s2308_s15, [#allocation3]  }
 0x267   :  { %2392 = dma.done.wait [#allocation3], 16  }
 0x268   :  { %2393 = vsyncadd [#allocation3], 4294967280 }
 0x269   :  { %2394 = dma.done.wait [#allocation5], 16  }
 0x26a   :  { %2395 = vsyncadd [#allocation5], 4294967280 }
 0x26b   :  { %2330 = vsyncpa [#allocation3], 1 }
 0x26c   :  { %2331 = vsyncpa [#allocation5], 1 }

</bundles_post_ra>
